<compile_context>
chip_gen: v6e
topology: v6e:2x2x1
jax: 0.10.0
libtpu: 0.0.40
codegen_flags: <defaults>
</compile_context>

<pallas_src>
import jax
import jax.numpy as jnp
from jax.experimental import pallas as pl
from jax.experimental.pallas import tpu as pltpu

EPS = 1e-5


def conv_stats_kernel(xpad_ref, w_ref, y_ref, stats_ref):
    # xpad_ref : (1, H+2, W+2, Cin)   one batch tile of the padded NHWC input
    # w_ref    : (9*Cin, Cp)          conv weights, Cout zero-padded to Cp (lane-dense)
    # y_ref    : (1, H*W, Cp)         conv output tile (lane-dense, no bias)
    # stats_ref: (1, 2, Cp)           per-tile [sum; centered sum-of-squares]
    _, Hp, Wp, Cin = xpad_ref.shape
    H, W = Hp - 2, Wp - 2

    x = xpad_ref[0]  # (H+2, W+2, Cin)

    # im2col: 9 shifted views concatenated along the contraction axis -> single matmul.
    patches = [
        x[kh:kh + H, kw:kw + W, :].reshape(H * W, Cin)
        for kh in range(3) for kw in range(3)
    ]
    im2col = jnp.concatenate(patches, axis=-1)                         # (H*W, 9*Cin)
    acc = jnp.dot(im2col, w_ref[...], preferred_element_type=jnp.float32)  # (H*W, Cp)
    # NOTE: conv bias intentionally omitted — a per-channel constant is exactly
    # cancelled by the training-mode BatchNorm mean subtraction.

    # Per-tile Welford-style statistics (centered M2 avoids E[x^2]-E[x]^2 cancellation).
    inv_cnt = 1.0 / (H * W)
    tile_sum = jnp.sum(acc, axis=0, keepdims=True)                     # (1, Cp)
    centered = acc - tile_sum * inv_cnt
    tile_m2 = jnp.sum(centered * centered, axis=0, keepdims=True)      # (1, Cp)
    stats_ref[0] = jnp.concatenate([tile_sum, tile_m2], axis=0)        # (2, Cp)

    # Lane-dense store of the raw conv output (normalization happens in pass 2).
    y_ref[0] = acc


def bn_relu_scale_kernel(y_ref, scale_ref, shift_ref, out_ref):
    # out = max(y * scale + shift, 0)
    #   scale = gamma * inv_std * sigmoid(w);  shift = (beta - gamma*mean*inv_std) * sigmoid(w)
    # sigmoid(w) > 0, so folding it before the ReLU is exact.
    out_ref[...] = jnp.maximum(y_ref[...] * scale_ref[...] + shift_ref[...], 0.0)


def _round_up(x, m):
    return ((x + m - 1) // m) * m


@jax.jit
def adap_conv_forward(x_nchw, params):
    """Pallas forward. x_nchw: (N, Cin, H, W) float32. Returns (N, Cout, H, W)."""
    # TODO(synk): fold the NCHW<->NHWC boundary transposes / halo pad into the kernel
    # (and tile H with a halo) for large images; at these shapes they fuse under jit.
    x = jnp.transpose(x_nchw, (0, 2, 3, 1)).astype(jnp.float32)        # NCHW -> NHWC
    N, H, W, Cin = x.shape
    xpad = jnp.pad(x, ((0, 0), (1, 1), (1, 1), (0, 0)))

    # OIHW -> HWIO -> (9*Cin, Cout), Cout zero-padded to a lane multiple.
    w_hwio = jnp.transpose(params["conv_w"], (2, 3, 1, 0)).astype(jnp.float32)
    Cout = w_hwio.shape[-1]
    Cp = _round_up(Cout, 128)
    w_flat = jnp.pad(w_hwio.reshape(9 * Cin, Cout), ((0, 0), (0, Cp - Cout)))

    HW = H * W

    # ---- pass 1: conv (single im2col matmul) + per-tile BN statistics ----
    y, stats = pl.pallas_call(
        conv_stats_kernel,
        grid=(N,),
        in_specs=[
            pl.BlockSpec((1, H + 2, W + 2, Cin), lambda n: (n, 0, 0, 0)),
            pl.BlockSpec((9 * Cin, Cp), lambda n: (0, 0)),
        ],
        out_specs=[
            pl.BlockSpec((1, HW, Cp), lambda n: (n, 0, 0)),
            pl.BlockSpec((1, 2, Cp), lambda n: (n, 0, 0)),
        ],
        out_shape=[
            jax.ShapeDtypeStruct((N, HW, Cp), jnp.float32),
            jax.ShapeDtypeStruct((N, 2, Cp), jnp.float32),
        ],
        compiler_params=pltpu.CompilerParams(dimension_semantics=("parallel",)),
    )(xpad, w_flat)

    # ---- combine per-tile stats (Chan parallel variance, equal tile counts) ----
    cnt = float(HW)
    sums = stats[:, 0, :Cout]                                          # (N, Cout)
    m2s = stats[:, 1, :Cout]
    tile_means = sums / cnt
    mean = jnp.mean(tile_means, axis=0)                                # (Cout,)
    m2 = jnp.sum(m2s, axis=0) + cnt * jnp.sum((tile_means - mean) ** 2, axis=0)
    var = m2 / (N * cnt)                                               # biased (training-mode BN)
    inv_std = jax.lax.rsqrt(var + EPS)

    s = jax.nn.sigmoid(params["weight"].astype(jnp.float32))[0]
    gamma = params["bn_gamma"].astype(jnp.float32)
    beta = params["bn_beta"].astype(jnp.float32)
    scale = jnp.pad(gamma * inv_std * s, (0, Cp - Cout)).reshape(1, Cp)
    shift = jnp.pad((beta - gamma * mean * inv_std) * s, (0, Cp - Cout)).reshape(1, Cp)

    # ---- pass 2: fused normalize + ReLU + sigmoid(weight) scale (lane-dense) ----
    out_p = pl.pallas_call(
        bn_relu_scale_kernel,
        grid=(N,),
        in_specs=[
            pl.BlockSpec((1, HW, Cp), lambda n: (n, 0, 0)),
            pl.BlockSpec((1, Cp), lambda n: (0, 0)),
            pl.BlockSpec((1, Cp), lambda n: (0, 0)),
        ],
        out_specs=pl.BlockSpec((1, HW, Cp), lambda n: (n, 0, 0)),
        out_shape=jax.ShapeDtypeStruct((N, HW, Cp), jnp.float32),
        compiler_params=pltpu.CompilerParams(dimension_semantics=("parallel",)),
    )(y, scale, shift)

    out_nhwc = out_p[:, :, :Cout].reshape(N, H, W, Cout)
    return jnp.transpose(out_nhwc, (0, 3, 1, 2))                       # NHWC -> NCHW


def ref_forward(x_nchw, params):
    """Pure-JAX reference matching the PyTorch module (fresh module, training-mode BN)."""
    x = jnp.transpose(x_nchw, (0, 2, 3, 1)).astype(jnp.float32)
    w_hwio = jnp.transpose(params["conv_w"], (2, 3, 1, 0)).astype(jnp.float32)
    y = jax.lax.conv_general_dilated(
        x, w_hwio, window_strides=(1, 1), padding="SAME",
        dimension_numbers=("NHWC", "HWIO", "NHWC"),
    ) + params["conv_b"]
    mean = jnp.mean(y, axis=(0, 1, 2), keepdims=True)
    var = jnp.mean((y - mean) ** 2, axis=(0, 1, 2), keepdims=True)
    y = (y - mean) / jnp.sqrt(var + EPS) * params["bn_gamma"] + params["bn_beta"]
    y = jnp.maximum(y, 0.0) * jax.nn.sigmoid(params["weight"])
    return jnp.transpose(y, (0, 3, 1, 2))


def init_params(key, in_channels, out_channels):
    k1, k2 = jax.random.split(key)
    fan_in = in_channels * 9
    bound = 1.0 / (fan_in ** 0.5)
    return {
        "conv_w": jax.random.uniform(k1, (out_channels, in_channels, 3, 3),
                                     jnp.float32, -bound, bound),   # OIHW, like PyTorch
        "conv_b": jax.random.uniform(k2, (out_channels,), jnp.float32, -bound, bound),
        "bn_gamma": jnp.ones((out_channels,), jnp.float32),
        "bn_beta": jnp.zeros((out_channels,), jnp.float32),
        "weight": jnp.zeros((1,), jnp.float32),  # nn.Parameter(torch.Tensor([0.0]))
    }


if __name__ == "__main__":
    key = jax.random.PRNGKey(0)
    kx, kp = jax.random.split(key)

    N, Cin, Cout, H, W = 2, 4, 8, 16, 16
    x = jax.random.normal(kx, (N, Cin, H, W), jnp.float32)
    params = init_params(kp, Cin, Cout)

    out = adap_conv_forward(x, params)
    out = jax.block_until_ready(out)

    ref = jax.block_until_ready(ref_forward(x, params))
    assert out.shape == (N, Cout, H, W)
    assert jnp.allclose(out, ref, atol=2e-4, rtol=2e-4), float(jnp.max(jnp.abs(out - ref)))

    print("KERNEL_OK")
</pallas_src>

<mosaic_0001>
module attributes {stable_mosaic.version = 11 : i64} {
  func.func @conv_stats_kernel(%arg0: i32, %arg1: memref<1x18x18x4xf32, #tpu.memory_space<vmem>>, %arg2: memref<36x128xf32, #tpu.memory_space<vmem>>, %arg3: memref<1x256x128xf32, #tpu.memory_space<vmem>>, %arg4: memref<1x2x128xf32, #tpu.memory_space<vmem>>) attributes {dimension_semantics = [#tpu.dimension_semantics<parallel>], iteration_bounds = array<i64: 2>, scalar_prefetch = 0 : i64, scratch_operands = 0 : i64, tpu.core_type = #tpu.core_type<tc>, window_params = [{transform_indices = @transform_0, window_bounds = array<i64: 1, 18, 18, 4>}, {pipeline_mode = #tpu.pipeline_mode<synchronous>, transform_indices = @transform_1, window_bounds = array<i64: 36, 128>}, {transform_indices = @transform_2, window_bounds = array<i64: 1, 256, 128>}, {transform_indices = @transform_3, window_bounds = array<i64: 1, 2, 128>}]} {
    %c0 = arith.constant 0 : index
    %c0_0 = arith.constant 0 : index
    %c0_1 = arith.constant 0 : index
    %c0_2 = arith.constant 0 : index
    %0 = vector.load %arg1[%c0, %c0_0, %c0_1, %c0_2] : memref<1x18x18x4xf32, #tpu.memory_space<vmem>>, vector<1x18x18x4xf32>
    %1 = vector.shape_cast %0 : vector<1x18x18x4xf32> to vector<18x18x4xf32>
    %2 = vector.extract_strided_slice %1 {offsets = [0, 0, 0], sizes = [16, 16, 4], strides = [1, 1, 1]} : vector<18x18x4xf32> to vector<16x16x4xf32>
    %3 = vector.shape_cast %2 : vector<16x16x4xf32> to vector<256x4xf32>
    %4 = vector.extract_strided_slice %1 {offsets = [0, 1, 0], sizes = [16, 16, 4], strides = [1, 1, 1]} : vector<18x18x4xf32> to vector<16x16x4xf32>
    %5 = vector.shape_cast %4 : vector<16x16x4xf32> to vector<256x4xf32>
    %6 = vector.extract_strided_slice %1 {offsets = [0, 2, 0], sizes = [16, 16, 4], strides = [1, 1, 1]} : vector<18x18x4xf32> to vector<16x16x4xf32>
    %7 = vector.shape_cast %6 : vector<16x16x4xf32> to vector<256x4xf32>
    %8 = vector.extract_strided_slice %1 {offsets = [1, 0, 0], sizes = [16, 16, 4], strides = [1, 1, 1]} : vector<18x18x4xf32> to vector<16x16x4xf32>
    %9 = vector.shape_cast %8 : vector<16x16x4xf32> to vector<256x4xf32>
    %10 = vector.extract_strided_slice %1 {offsets = [1, 1, 0], sizes = [16, 16, 4], strides = [1, 1, 1]} : vector<18x18x4xf32> to vector<16x16x4xf32>
    %11 = vector.shape_cast %10 : vector<16x16x4xf32> to vector<256x4xf32>
    %12 = vector.extract_strided_slice %1 {offsets = [1, 2, 0], sizes = [16, 16, 4], strides = [1, 1, 1]} : vector<18x18x4xf32> to vector<16x16x4xf32>
    %13 = vector.shape_cast %12 : vector<16x16x4xf32> to vector<256x4xf32>
    %14 = vector.extract_strided_slice %1 {offsets = [2, 0, 0], sizes = [16, 16, 4], strides = [1, 1, 1]} : vector<18x18x4xf32> to vector<16x16x4xf32>
    %15 = vector.shape_cast %14 : vector<16x16x4xf32> to vector<256x4xf32>
    %16 = vector.extract_strided_slice %1 {offsets = [2, 1, 0], sizes = [16, 16, 4], strides = [1, 1, 1]} : vector<18x18x4xf32> to vector<16x16x4xf32>
    %17 = vector.shape_cast %16 : vector<16x16x4xf32> to vector<256x4xf32>
    %18 = vector.extract_strided_slice %1 {offsets = [2, 2, 0], sizes = [16, 16, 4], strides = [1, 1, 1]} : vector<18x18x4xf32> to vector<16x16x4xf32>
    %19 = vector.shape_cast %18 : vector<16x16x4xf32> to vector<256x4xf32>
    %20 = tpu.concatenate %3, %5, %7, %9, %11, %13, %15, %17, %19 in 1 : vector<256x4xf32>, vector<256x4xf32>, vector<256x4xf32>, vector<256x4xf32>, vector<256x4xf32>, vector<256x4xf32>, vector<256x4xf32>, vector<256x4xf32>, vector<256x4xf32> -> vector<256x36xf32>
    %c0_3 = arith.constant 0 : index
    %c0_4 = arith.constant 0 : index
    %21 = vector.load %arg2[%c0_3, %c0_4] : memref<36x128xf32, #tpu.memory_space<vmem>>, vector<36x128xf32>
    %cst = arith.constant dense<0.000000e+00> : vector<256x128xf32>
    %22 = tpu.matmul %20, %21, %cst {dimension_numbers = #tpu.dot_dimension_numbers<[1], [0], [0], [1], [0, 0, 1, 1], [], []>} : vector<256x36xf32>, vector<36x128xf32>, vector<256x128xf32> -> vector<256x128xf32>
    %cst_5 = arith.constant dense<0.000000e+00> : vector<128xf32>
    %23 = vector.multi_reduction <add>, %22, %cst_5 [0] : vector<256x128xf32> to vector<128xf32>
    %24 = vector.shape_cast %23 : vector<128xf32> to vector<1x128xf32>
    %cst_6 = arith.constant 3.906250e-03 : f32
    %25 = vector.broadcast %cst_6 : f32 to vector<1x128xf32>
    %26 = arith.mulf %24, %25 : vector<1x128xf32>
    %27 = vector.broadcast %26 : vector<1x128xf32> to vector<256x128xf32>
    %28 = arith.subf %22, %27 : vector<256x128xf32>
    %29 = arith.mulf %28, %28 : vector<256x128xf32>
    %cst_7 = arith.constant dense<0.000000e+00> : vector<128xf32>
    %30 = vector.multi_reduction <add>, %29, %cst_7 [0] : vector<256x128xf32> to vector<128xf32>
    %31 = vector.shape_cast %30 : vector<128xf32> to vector<1x128xf32>
    %32 = tpu.concatenate %24, %31 in 0 : vector<1x128xf32>, vector<1x128xf32> -> vector<2x128xf32>
    %c0_8 = arith.constant 0 : index
    %c0_9 = arith.constant 0 : index
    %c0_10 = arith.constant 0 : index
    %33 = vector.load %arg4[%c0_8, %c0_9, %c0_10] : memref<1x2x128xf32, #tpu.memory_space<vmem>>, vector<1x2x128xf32>
    %34 = vector.shape_cast %33 : vector<1x2x128xf32> to vector<2x128xf32>
    %35 = vector.shape_cast %32 : vector<2x128xf32> to vector<1x2x128xf32>
    tpu.vector_store %arg4[%c0_8, %c0_9, %c0_10], %35 {strides = array<i32>} : memref<1x2x128xf32, #tpu.memory_space<vmem>>, vector<1x2x128xf32>,
    %c0_11 = arith.constant 0 : index
    %c0_12 = arith.constant 0 : index
    %c0_13 = arith.constant 0 : index
    %36 = vector.load %arg3[%c0_11, %c0_12, %c0_13] : memref<1x256x128xf32, #tpu.memory_space<vmem>>, vector<1x256x128xf32>
    %37 = vector.shape_cast %36 : vector<1x256x128xf32> to vector<256x128xf32>
    %38 = vector.shape_cast %22 : vector<256x128xf32> to vector<1x256x128xf32>
    tpu.vector_store %arg3[%c0_11, %c0_12, %c0_13], %38 {strides = array<i32>} : memref<1x256x128xf32, #tpu.memory_space<vmem>>, vector<1x256x128xf32>,
    return
  }
  func.func @transform_0(%arg0: i32) -> (i32, i32, i32, i32) {
    %c0_i32 = arith.constant 0 : i32
    %c0_i32_0 = arith.constant 0 : i32
    %c0_i32_1 = arith.constant 0 : i32
    %c0_i32_2 = arith.constant 0 : i32
    return %arg0, %c0_i32, %c0_i32_0, %c0_i32_1 : i32, i32, i32, i32
  }
  func.func @transform_1(%arg0: i32) -> (i32, i32) {
    %c0_i32 = arith.constant 0 : i32
    %c0_i32_0 = arith.constant 0 : i32
    %c0_i32_1 = arith.constant 0 : i32
    return %c0_i32, %c0_i32_0 : i32, i32
  }
  func.func @transform_2(%arg0: i32) -> (i32, i32, i32) {
    %c0_i32 = arith.constant 0 : i32
    %c0_i32_0 = arith.constant 0 : i32
    %c0_i32_1 = arith.constant 0 : i32
    return %arg0, %c0_i32, %c0_i32_0 : i32, i32, i32
  }
  func.func @transform_3(%arg0: i32) -> (i32, i32, i32) {
    %c0_i32 = arith.constant 0 : i32
    %c0_i32_0 = arith.constant 0 : i32
    %c0_i32_1 = arith.constant 0 : i32
    return %arg0, %c0_i32, %c0_i32_0 : i32, i32, i32
  }
}

module attributes {stable_mosaic.version = 11 : i64} {
  func.func @bn_relu_scale_kernel(%arg0: i32, %arg1: memref<1x256x128xf32, #tpu.memory_space<vmem>>, %arg2: memref<1x128xf32, #tpu.memory_space<vmem>>, %arg3: memref<1x128xf32, #tpu.memory_space<vmem>>, %arg4: memref<1x256x128xf32, #tpu.memory_space<vmem>>) attributes {dimension_semantics = [#tpu.dimension_semantics<parallel>], iteration_bounds = array<i64: 2>, scalar_prefetch = 0 : i64, scratch_operands = 0 : i64, tpu.core_type = #tpu.core_type<tc>, window_params = [{transform_indices = @transform_0, window_bounds = array<i64: 1, 256, 128>}, {pipeline_mode = #tpu.pipeline_mode<synchronous>, transform_indices = @transform_1, window_bounds = array<i64: 1, 128>}, {pipeline_mode = #tpu.pipeline_mode<synchronous>, transform_indices = @transform_2, window_bounds = array<i64: 1, 128>}, {transform_indices = @transform_3, window_bounds = array<i64: 1, 256, 128>}]} {
    %c0 = arith.constant 0 : index
    %c0_0 = arith.constant 0 : index
    %c0_1 = arith.constant 0 : index
    %0 = vector.load %arg1[%c0, %c0_0, %c0_1] : memref<1x256x128xf32, #tpu.memory_space<vmem>>, vector<1x256x128xf32>
    %c0_2 = arith.constant 0 : index
    %c0_3 = arith.constant 0 : index
    %1 = vector.load %arg2[%c0_2, %c0_3] : memref<1x128xf32, #tpu.memory_space<vmem>>, vector<1x128xf32>
    %2 = vector.shape_cast %1 : vector<1x128xf32> to vector<1x1x128xf32>
    %3 = vector.broadcast %2 : vector<1x1x128xf32> to vector<1x256x128xf32>
    %4 = arith.mulf %0, %3 : vector<1x256x128xf32>
    %c0_4 = arith.constant 0 : index
    %c0_5 = arith.constant 0 : index
    %5 = vector.load %arg3[%c0_4, %c0_5] : memref<1x128xf32, #tpu.memory_space<vmem>>, vector<1x128xf32>
    %6 = vector.shape_cast %5 : vector<1x128xf32> to vector<1x1x128xf32>
    %7 = vector.broadcast %6 : vector<1x1x128xf32> to vector<1x256x128xf32>
    %8 = arith.addf %4, %7 : vector<1x256x128xf32>
    %cst = arith.constant 0.000000e+00 : f32
    %9 = vector.broadcast %cst : f32 to vector<1x256x128xf32>
    %10 = arith.maximumf %8, %9 : vector<1x256x128xf32>
    %c0_6 = arith.constant 0 : index
    %c0_7 = arith.constant 0 : index
    %c0_8 = arith.constant 0 : index
    %11 = vector.load %arg4[%c0_6, %c0_7, %c0_8] : memref<1x256x128xf32, #tpu.memory_space<vmem>>, vector<1x256x128xf32>
    tpu.vector_store %arg4[%c0_6, %c0_7, %c0_8], %10 {strides = array<i32>} : memref<1x256x128xf32, #tpu.memory_space<vmem>>, vector<1x256x128xf32>,
    return
  }
  func.func @transform_0(%arg0: i32) -> (i32, i32, i32) {
    %c0_i32 = arith.constant 0 : i32
    %c0_i32_0 = arith.constant 0 : i32
    %c0_i32_1 = arith.constant 0 : i32
    return %arg0, %c0_i32, %c0_i32_0 : i32, i32, i32
  }
  func.func @transform_1(%arg0: i32) -> (i32, i32) {
    %c0_i32 = arith.constant 0 : i32
    %c0_i32_0 = arith.constant 0 : i32
    %c0_i32_1 = arith.constant 0 : i32
    return %c0_i32, %c0_i32_0 : i32, i32
  }
  func.func @transform_2(%arg0: i32) -> (i32, i32) {
    %c0_i32 = arith.constant 0 : i32
    %c0_i32_0 = arith.constant 0 : i32
    %c0_i32_1 = arith.constant 0 : i32
    return %c0_i32, %c0_i32_0 : i32, i32
  }
  func.func @transform_3(%arg0: i32) -> (i32, i32, i32) {
    %c0_i32 = arith.constant 0 : i32
    %c0_i32_0 = arith.constant 0 : i32
    %c0_i32_1 = arith.constant 0 : i32
    return %arg0, %c0_i32, %c0_i32_0 : i32, i32, i32
  }
}

</mosaic_0001>

<bundles_post_ra>
// kernel: adap_conv_forward.3
= control target key start
LH: loop header
LB: loop body
LE: loop exit
PB: predicated region body
PF: predicated region fallthrough
CT: control target
= control target key end

     0   :  { %s451_s12 = smov 0   ;;  %s610_s0 = inlined_call_operand.vmem [shape: f32[2,256,128], index: 0, kind: input, shape index: {}]   ;;  %s611_s1 = inlined_call_operand.vmem [shape: f32[1,128], index: 1, kind: input, shape index: {}]   ;;  %s612_s2 = inlined_call_operand.vmem [shape: f32[1,128], index: 2, kind: input, shape index: {}]   ;;  %s613_s3 = inlined_call_operand.vmem [shape: f32[2,256,128], index: 3, kind: output, shape index: {}]  }
   0x1 LB: > { %s400_s13 = sadd.s32 4294967295, %s429_s12   ;;  %p404_p0 = scmp.ge.s32.totalorder %s429_s12, 1  ;;  %s429_s12 = sphi %s451_s12, %s13_s12  }
   0x2   : > { %p137_p1 = scmp.lt.s32.totalorder %s429_s12, 3 }
   0x4   : > { %p138_p2 = pnand %p404_p0, %p137_p1 }
   0x5   : > { %p161_p3 = scmp.lt.s32.totalorder (!%p138_p2), %s400_s13, 1 }
   0x6   : > { %141 = sbr.rel (%p138_p2) target bundleno = 44 (0x2c), region = 32 }
   0xb   : > { %s615_s13 = smov (!%p161_p3, %s400_s13), 1  ;;  %v462_v0 = vld [vmem:[%s611_s1] ss:$0 sm:$0xff] }
   0xc   : > { %s413_s14 = sshll.u32 %s615_s13, 8  ;;  %v472_v1 = vld [vmem:[%s612_s2] ss:$0 sm:$0xff] }
   0xd   : > { %s467_s19 = scalar_lea.vmem %s610_s0, %s413_s14  ;;  %s495_s24 = scalar_lea.vmem %s613_s3, %s413_s14 }
   0xe   : > { %v171_v2 = vld [vmem:[%s467_s19] sm:$0xff]  ;;  %v172_v3 = vld [vmem:[%s467_s19 + $0x8] sm:$0xff]  ;;  %v173_v4 = vld [vmem:[%s467_s19 + $0x10] sm:$0xff] }
   0xf   : > { %v210_v5 = vmul.f32 %v462_v0, %v171_v2  ;;  %v211_v6 = vmul.f32 %v462_v0, %v172_v3  ;;  %v212_v7 = vmul.f32 %v462_v0, %v173_v4  ;;  %v174_v8 = vld [vmem:[%s467_s19 + $0x18] sm:$0xff]  ;;  %v175_v9 = vld [vmem:[%s467_s19 + $0x20] sm:$0xff]  ;;  %v176_v10 = vld [vmem:[%s467_s19 + $0x28] sm:$0xff] }
  0x10   : > { %v213_v11 = vmul.f32 %v462_v0, %v174_v8  ;;  %v214_v12 = vmul.f32 %v462_v0, %v175_v9  ;;  %v215_v13 = vmul.f32 %v462_v0, %v176_v10  ;;  %v177_v14 = vld [vmem:[%s467_s19 + $0x30] sm:$0xff]  ;;  %v178_v15 = vld [vmem:[%s467_s19 + $0x38] sm:$0xff]  ;;  %v179_v24 = vld [vmem:[%s467_s19 + $0x40] sm:$0xff] }
  0x11   : > { %v249_v16 = vadd.f32 %v472_v1, %v210_v5  ;;  %v250_v17 = vadd.f32 %v472_v1, %v211_v6  ;;  %v251_v18 = vadd.f32 %v472_v1, %v212_v7  ;;  %v216_v19 = vmul.f32 %v462_v0, %v177_v14  ;;  %v180_v25 = vld [vmem:[%s467_s19 + $0x48] sm:$0xff]  ;;  %v181_v26 = vld [vmem:[%s467_s19 + $0x50] sm:$0xff]  ;;  %v182_v31 = vld [vmem:[%s467_s19 + $0x58] sm:$0xff] }
  0x12   : > { %v252_v20 = vadd.f32 %v472_v1, %v213_v11  ;;  %v253_v21 = vadd.f32 %v472_v1, %v214_v12  ;;  %v254_v22 = vadd.f32 %v472_v1, %v215_v13  ;;  %v217_v23 = vmul.f32 %v462_v0, %v178_v15  ;;  %v183_v32 = vld [vmem:[%s467_s19 + $0x60] sm:$0xff]  ;;  %v184_v33 = vld [vmem:[%s467_s19 + $0x68] sm:$0xff]  ;;  %v185_v38 = vld [vmem:[%s467_s19 + $0x70] sm:$0xff] }
  0x13   : > { %v281_v27 = vmax.f32 %v249_v16, 0.0  ;;  %v282_v28 = vmax.f32 %v250_v17, 0.0  ;;  %v283_v29 = vmax.f32 %v251_v18, 0.0  ;;  %v255_v30 = vadd.f32 %v472_v1, %v216_v19  ;;  %v186_v43 = vld [vmem:[%s467_s19 + $0x78] sm:$0xff]  ;;  %v187_v56 = vld [vmem:[%s467_s19 + $0x80] sm:$0xff]  ;;  %v188_v57 = vld [vmem:[%s467_s19 + $0x88] sm:$0xff] }
  0x14   : > { %v284_v34 = vmax.f32 %v252_v20, 0.0  ;;  %v285_v35 = vmax.f32 %v253_v21, 0.0  ;;  %v286_v36 = vmax.f32 %v254_v22, 0.0  ;;  %v256_v37 = vadd.f32 %v472_v1, %v217_v23  ;;  %v189_v58 = vld [vmem:[%s467_s19 + $0x90] sm:$0xff]  ;;  %v190_v63 = vld [vmem:[%s467_s19 + $0x98] sm:$0xff]  ;;  %v191_v2 = vld [vmem:[%s467_s19 + $0xa0] sm:$0xff] }
  0x15   : > { %313 = vst [vmem:[%s495_s24] sm:$0xff] %v281_v27  ;;  %314 = vst [vmem:[%s495_s24 + $0x8] sm:$0xff] %v282_v28  ;;  %v287_v39 = vmax.f32 %v255_v30, 0.0  ;;  %v218_v40 = vmul.f32 %v462_v0, %v179_v24  ;;  %v219_v41 = vmul.f32 %v462_v0, %v180_v25  ;;  %v220_v42 = vmul.f32 %v462_v0, %v181_v26  ;;  %v192_v3 = vld [vmem:[%s467_s19 + $0xa8] sm:$0xff]  ;;  %v193_v8 = vld [vmem:[%s467_s19 + $0xb0] sm:$0xff] }
  0x16   : > { %315 = vst [vmem:[%s495_s24 + $0x10] sm:$0xff] %v283_v29  ;;  %316 = vst [vmem:[%s495_s24 + $0x18] sm:$0xff] %v284_v34  ;;  %v288_v44 = vmax.f32 %v256_v37, 0.0  ;;  %v221_v45 = vmul.f32 %v462_v0, %v182_v31  ;;  %v222_v46 = vmul.f32 %v462_v0, %v183_v32  ;;  %v223_v47 = vmul.f32 %v462_v0, %v184_v33  ;;  %v194_v13 = vld [vmem:[%s467_s19 + $0xb8] sm:$0xff]  ;;  %v195_v26 = vld [vmem:[%s467_s19 + $0xc0] sm:$0xff] }
  0x17   : > { %317 = vst [vmem:[%s495_s24 + $0x20] sm:$0xff] %v285_v35  ;;  %318 = vst [vmem:[%s495_s24 + $0x28] sm:$0xff] %v286_v36  ;;  %v257_v48 = vadd.f32 %v472_v1, %v218_v40  ;;  %v258_v49 = vadd.f32 %v472_v1, %v219_v41  ;;  %v259_v50 = vadd.f32 %v472_v1, %v220_v42  ;;  %v196_v27 = vld [vmem:[%s467_s19 + $0xc8] sm:$0xff]  ;;  %v197_v28 = vld [vmem:[%s467_s19 + $0xd0] sm:$0xff] }
  0x18   : > { %319 = vst [vmem:[%s495_s24 + $0x30] sm:$0xff] %v287_v39  ;;  %v224_v51 = vmul.f32 %v462_v0, %v185_v38  ;;  %320 = vst [vmem:[%s495_s24 + $0x38] sm:$0xff] %v288_v44  ;;  %v260_v52 = vadd.f32 %v472_v1, %v221_v45  ;;  %v261_v53 = vadd.f32 %v472_v1, %v222_v46  ;;  %v198_v33 = vld [vmem:[%s467_s19 + $0xd8] sm:$0xff]  ;;  %v199_v34 = vld [vmem:[%s467_s19 + $0xe0] sm:$0xff] }
  0x19   : > { %v262_v54 = vadd.f32 %v472_v1, %v223_v47  ;;  %v225_v55 = vmul.f32 %v462_v0, %v186_v43  ;;  %v289_v59 = vmax.f32 %v257_v48, 0.0  ;;  %v290_v60 = vmax.f32 %v258_v49, 0.0  ;;  %v200_v35 = vld [vmem:[%s467_s19 + $0xe8] sm:$0xff]  ;;  %v201_v40 = vld [vmem:[%s467_s19 + $0xf0] sm:$0xff]  ;;  %v202_v45 = vld [vmem:[%s467_s19 + $0xf8] sm:$0xff] }
  0x1a   : > { %v291_v61 = vmax.f32 %v259_v50, 0.0  ;;  %v263_v62 = vadd.f32 %v472_v1, %v224_v51  ;;  %v292_v4 = vmax.f32 %v260_v52, 0.0  ;;  %v293_v5 = vmax.f32 %v261_v53, 0.0 }
  0x1b   : > { %v294_v6 = vmax.f32 %v262_v54, 0.0  ;;  %v264_v7 = vadd.f32 %v472_v1, %v225_v55  ;;  %321 = vst [vmem:[%s495_s24 + $0x40] sm:$0xff] %v289_v59  ;;  %322 = vst [vmem:[%s495_s24 + $0x48] sm:$0xff] %v290_v60  ;;  %v226_v10 = vmul.f32 %v462_v0, %v187_v56  ;;  %v227_v11 = vmul.f32 %v462_v0, %v188_v57 }
  0x1c   : > { %323 = vst [vmem:[%s495_s24 + $0x50] sm:$0xff] %v291_v61  ;;  %v295_v9 = vmax.f32 %v263_v62, 0.0  ;;  %v228_v12 = vmul.f32 %v462_v0, %v189_v58  ;;  %324 = vst [vmem:[%s495_s24 + $0x58] sm:$0xff] %v292_v4  ;;  %v229_v15 = vmul.f32 %v462_v0, %v190_v63  ;;  %v230_v16 = vmul.f32 %v462_v0, %v191_v2 }
  0x1d   : > { %325 = vst [vmem:[%s495_s24 + $0x60] sm:$0xff] %v293_v5  ;;  %326 = vst [vmem:[%s495_s24 + $0x68] sm:$0xff] %v294_v6  ;;  %v296_v14 = vmax.f32 %v264_v7, 0.0  ;;  %v231_v17 = vmul.f32 %v462_v0, %v192_v3  ;;  %v265_v18 = vadd.f32 %v472_v1, %v226_v10  ;;  %v266_v19 = vadd.f32 %v472_v1, %v227_v11 }
  0x1e   : > { %327 = vst [vmem:[%s495_s24 + $0x70] sm:$0xff] %v295_v9  ;;  %v267_v20 = vadd.f32 %v472_v1, %v228_v12  ;;  %v232_v21 = vmul.f32 %v462_v0, %v193_v8  ;;  %v268_v22 = vadd.f32 %v472_v1, %v229_v15  ;;  %v269_v23 = vadd.f32 %v472_v1, %v230_v16 }
  0x1f   : > { %328 = vst [vmem:[%s495_s24 + $0x78] sm:$0xff] %v296_v14  ;;  %v270_v24 = vadd.f32 %v472_v1, %v231_v17  ;;  %v233_v25 = vmul.f32 %v462_v0, %v194_v13  ;;  %v297_v29 = vmax.f32 %v265_v18, 0.0  ;;  %v298_v30 = vmax.f32 %v266_v19, 0.0 }
  0x20   : > { %v299_v31 = vmax.f32 %v267_v20, 0.0  ;;  %v271_v32 = vadd.f32 %v472_v1, %v232_v21  ;;  %v300_v36 = vmax.f32 %v268_v22, 0.0  ;;  %v301_v37 = vmax.f32 %v269_v23, 0.0 }
  0x21   : > { %v302_v38 = vmax.f32 %v270_v24, 0.0  ;;  %v272_v39 = vadd.f32 %v472_v1, %v233_v25  ;;  %329 = vst [vmem:[%s495_s24 + $0x80] sm:$0xff] %v297_v29  ;;  %330 = vst [vmem:[%s495_s24 + $0x88] sm:$0xff] %v298_v30  ;;  %v234_v42 = vmul.f32 %v462_v0, %v195_v26  ;;  %v235_v43 = vmul.f32 %v462_v0, %v196_v27 }
  0x22   : > { %331 = vst [vmem:[%s495_s24 + $0x90] sm:$0xff] %v299_v31  ;;  %v303_v41 = vmax.f32 %v271_v32, 0.0  ;;  %v236_v44 = vmul.f32 %v462_v0, %v197_v28  ;;  %332 = vst [vmem:[%s495_s24 + $0x98] sm:$0xff] %v300_v36  ;;  %v237_v47 = vmul.f32 %v462_v0, %v198_v33  ;;  %v238_v48 = vmul.f32 %v462_v0, %v199_v34 }
  0x23   : > { %333 = vst [vmem:[%s495_s24 + $0xa0] sm:$0xff] %v301_v37  ;;  %334 = vst [vmem:[%s495_s24 + $0xa8] sm:$0xff] %v302_v38  ;;  %v304_v46 = vmax.f32 %v272_v39, 0.0  ;;  %v239_v49 = vmul.f32 %v462_v0, %v200_v35  ;;  %v273_v50 = vadd.f32 %v472_v1, %v234_v42  ;;  %v274_v51 = vadd.f32 %v472_v1, %v235_v43 }
  0x24   : > { %335 = vst [vmem:[%s495_s24 + $0xb0] sm:$0xff] %v303_v41  ;;  %v275_v52 = vadd.f32 %v472_v1, %v236_v44  ;;  %v240_v53 = vmul.f32 %v462_v0, %v201_v40  ;;  %v276_v54 = vadd.f32 %v472_v1, %v237_v47  ;;  %v277_v55 = vadd.f32 %v472_v1, %v238_v48 }
  0x25   : > { %336 = vst [vmem:[%s495_s24 + $0xb8] sm:$0xff] %v304_v46  ;;  %v278_v56 = vadd.f32 %v472_v1, %v239_v49  ;;  %v241_v57 = vmul.f32 %v462_v0, %v202_v45  ;;  %v305_v58 = vmax.f32 %v273_v50, 0.0  ;;  %v306_v59 = vmax.f32 %v274_v51, 0.0 }
  0x26   : > { %v307_v60 = vmax.f32 %v275_v52, 0.0  ;;  %v279_v61 = vadd.f32 %v472_v1, %v240_v53  ;;  %v308_v62 = vmax.f32 %v276_v54, 0.0  ;;  %v309_v63 = vmax.f32 %v277_v55, 0.0 }
  0x27   : > { %v310_v2 = vmax.f32 %v278_v56, 0.0  ;;  %v280_v3 = vadd.f32 %v472_v1, %v241_v57  ;;  %337 = vst [vmem:[%s495_s24 + $0xc0] sm:$0xff] %v305_v58  ;;  %338 = vst [vmem:[%s495_s24 + $0xc8] sm:$0xff] %v306_v59 }
  0x28   : > { %339 = vst [vmem:[%s495_s24 + $0xd0] sm:$0xff] %v307_v60  ;;  %v311_v4 = vmax.f32 %v279_v61, 0.0  ;;  %340 = vst [vmem:[%s495_s24 + $0xd8] sm:$0xff] %v308_v62 }
  0x29   : > { %341 = vst [vmem:[%s495_s24 + $0xe0] sm:$0xff] %v309_v63  ;;  %342 = vst [vmem:[%s495_s24 + $0xe8] sm:$0xff] %v310_v2  ;;  %v312_v0 = vmax.f32 %v280_v3, 0.0 }
  0x2a   : > { %343 = vst [vmem:[%s495_s24 + $0xf0] sm:$0xff] %v311_v4 }
  0x2b   : > { %344 = vst [vmem:[%s495_s24 + $0xf8] sm:$0xff] %v312_v0 }
  0x2c PF: > { %s13_s12 = sadd.s32 1, %s429_s12  }
  0x2d   : > { %p10_p4 = scmp.ge.s32.totalorder %s13_s12, 4  }
  0x2f   :  { %12 = sbr.rel (!%p10_p4) target bundleno = 1 (0x1), region = 62 }

// kernel: adap_conv_forward.2
= control target key start
LH: loop header
LB: loop body
LE: loop exit
PB: predicated region body
PF: predicated region fallthrough
CT: control target
= control target key end

     0   :  { %s2328_s12 = smov 0   ;;  %s3984_s0 = inlined_call_operand.vmem [shape: f32[2,18,18,4], index: 0, kind: input, shape index: {}]   ;;  %s3985_s1 = inlined_call_operand.vmem [shape: f32[36,128], index: 1, kind: input, shape index: {}]   ;;  %s3986_s2 = inlined_call_operand.vmem [shape: f32[2,256,128], index: 2, kind: output, shape index: {0}]   ;;  %s3987_s3 = inlined_call_operand.vmem [shape: f32[2,2,128], index: 3, kind: output, shape index: {1}]  }
   0x1 LB: > { %s2095_s13 = sadd.s32 4294967295, %s2298_s12   ;;  %p2099_p0 = scmp.ge.s32.totalorder %s2298_s12, 1  ;;  %s2298_s12 = sphi %s2328_s12, %s14_s12  }
   0x2   : > { %p140_p1 = scmp.lt.s32.totalorder %s2298_s12, 3 }
   0x4   : > { %p141_p2 = pnand %p2099_p0, %p140_p1 }
   0x6   : > { %144 = sbr.rel (%p141_p2) target bundleno = 940 (0x3ac), region = 28 }
   0xb   : > { %p168_p3 = scmp.lt.s32.totalorder %s2095_s13, 1  ;;  %vm284_vm0 = vcmask 1046528   ;;  %s2300_s18 = smov 4   ;;  %vm365_vm1 = vcmask 1045504   ;;  %vm1606_vm2 = vcmask 1043456   ;;  %vm1240_vm3 = vcmask 31744  }
   0xc   : > { %s2301_s19 = smov 8   ;;  %s2302_s20 = smov 12   ;;  %vm1273_vm4 = vcmask 64512   ;;  %vm1306_vm5 = vcmask 97280   ;;  %vm1339_vm6 = vcmask 130048   ;;  %vm1372_vm7 = vcmask 162816  }
   0xd   : > { %s4102_s13 = smov (!%p168_p3, %s2095_s13), 1  ;;  %s2303_s21 = smov 16   ;;  %vm1405_vm8 = vcmask 195584   ;;  %vm1438_vm9 = vcmask 228352   ;;  %vm1471_vm10 = vcmask 261120   ;;  %vm1509_vm11 = vcmask 293888  }
   0xe   : > { %s2245_s14 = smul.u32 432, %s4102_s13  ;;  %s2304_s22 = smov 20   ;;  %vm1974_vm12 = vcmask 1040384  }
   0xf   : > { %s2305_s27 = smov 24   ;;  %s2306_s30 = smov 28  }
  0x10   : > { %s2342_s17 = scalar_lea.vmem %s3984_s0, %s2245_s14  ;;  %s2307_s8 = smov 32  }
  0x11   : > { %v2345_v0 = vld [vmem:[%s2342_s17 + $0x18] sm:$0xff]  ;;  %v2348_v1 = vld [vmem:[%s2342_s17 + $0x20] sm:$0xff]  ;;  %v2356_v5 = vld [vmem:[%s2342_s17 + $0x8] sm:$0xff]  ;;  %s2139_s9 = sshll.u32 %s4102_s13, 8  ;;  %s2103_s15 = sshll.u32 %s4102_s13, 1 }
  0x12   : > { %v2351_v2 = vld [vmem:[%s2342_s17] sm:$0xff]  ;;  %v290_v3 = vrot.slane %v2345_v0, 1  ;;  %v291_v4 = vrot.slane %v2348_v1, 1  ;;  %v2360_v7 = vld [vmem:[%s2342_s17 + $0x28] sm:$0x3]  ;;  %v286_v8 = vrot.slane %v2356_v5, 1  ;;  %s3458_s14 = scalar_lea.vmem %s3986_s2, %s2139_s9 }
  0x13   : > { %v285_v6 = vrot.slane %v2351_v2, 1  ;;  %v293_v9 = vrot.slane %v2360_v7, 1  ;;  %v2365_v10 = vld [vmem:[%s2342_s17 + $0x10] sm:$0x3]  ;;  %v2368_v11 = vld [vmem:[%s2342_s17 + $0x38] sm:$0xff]  ;;  %v2398_v24 = vld [vmem:[%s2342_s17 + $0x48] sm:$0xff] }
  0x14   : > { %v2371_v12 = vsel %vm284_vm0, %v290_v3, %v291_v4  ;;  %v288_v13 = vrot.slane %v2365_v10, 1  ;;  %v2375_v14 = vld [vmem:[%s2342_s17 + $0x40] sm:$0x3]  ;;  %v2378_v15 = vld [vmem:[%s2342_s17 + $0x30] sm:$0xff]  ;;  %v296_v18 = vrot.slane %v2368_v11, 1  ;;  %v300_v29 = vrot.slane %v2398_v24, 1 }
  0x15   : > { %476 = vrot.lane.b32.xlu1 %v2371_v12, %s2300_s18  ;;  %v287_v16 = vsel %vm284_vm0, %v285_v6, %v286_v8  ;;  %v2385_v17 = vsel %vm284_vm0, %v291_v4, %v293_v9  ;;  %v298_v19 = vrot.slane %v2375_v14, 1  ;;  %v295_v21 = vrot.slane %v2378_v15, 1  ;;  %v2392_v22 = vld [vmem:[%s2342_s17 + $0x50] sm:$0xff]  ;;  %v2395_v23 = vld [vmem:[%s2342_s17 + $0x58] sm:$0x3]  ;;  %v2413_v30 = vld [vmem:[%s2342_s17 + $0x68] sm:$0xff] }
  0x16   : > { %472 = vrot.lane.b32.xlu0 %v287_v16, %s2300_s18  ;;  %v289_v20 = vsel %vm284_vm0, %v286_v8, %v288_v13  ;;  %v301_v26 = vrot.slane %v2392_v22, 1  ;;  %v303_v27 = vrot.slane %v2395_v23, 1  ;;  %v2416_v31 = vld [vmem:[%s2342_s17 + $0x70] sm:$0x3]  ;;  %v2419_v32 = vld [vmem:[%s2342_s17 + $0x60] sm:$0xff]  ;;  %v306_v34 = vrot.slane %v2413_v30, 1 }
  0x17   : > { %v2404_v25 = vsel %vm284_vm0, %v296_v18, %v298_v19  ;;  %v2409_v28 = vsel %vm284_vm0, %v295_v21, %v296_v18  ;;  %v308_v35 = vrot.slane %v2416_v31, 1  ;;  %v305_v37 = vrot.slane %v2419_v32, 1  ;;  %v2435_v38 = vld [vmem:[%s2342_s17 + $0x80] sm:$0xff]  ;;  %v2438_v39 = vld [vmem:[%s2342_s17 + $0x88] sm:$0x3]  ;;  %v2441_v40 = vld [vmem:[%s2342_s17 + $0x78] sm:$0xff] }
  0x18   : > { %v2426_v33 = vsel %vm284_vm0, %v301_v26, %v303_v27  ;;  %v2431_v36 = vsel %vm284_vm0, %v300_v29, %v301_v26  ;;  %v311_v42 = vrot.slane %v2435_v38, 1  ;;  %v313_v43 = vrot.slane %v2438_v39, 1  ;;  %v2457_v46 = vld [vmem:[%s2342_s17 + $0x98] sm:$0xff]  ;;  %v2460_v47 = vld [vmem:[%s2342_s17 + $0xa0] sm:$0x3]  ;;  %v2463_v48 = vld [vmem:[%s2342_s17 + $0x90] sm:$0xff] }
  0x19   : > { %478 = vrot.lane.b32.xlu1 %v2385_v17, %s2300_s18  ;;  %v2448_v41 = vsel %vm284_vm0, %v306_v34, %v308_v35  ;;  %v2453_v44 = vsel %vm284_vm0, %v305_v37, %v306_v34  ;;  %v310_v45 = vrot.slane %v2441_v40, 1  ;;  %v316_v50 = vrot.slane %v2457_v46, 1  ;;  %v2479_v54 = vld [vmem:[%s2342_s17 + $0xb0] sm:$0xff]  ;;  %v2482_v55 = vld [vmem:[%s2342_s17 + $0xb8] sm:$0x3]  ;;  %v2485_v56 = vld [vmem:[%s2342_s17 + $0xa8] sm:$0xff] }
  0x1a   : > { %474 = vrot.lane.b32.xlu0 %v289_v20, %s2300_s18  ;;  %v2470_v49 = vsel %vm284_vm0, %v311_v42, %v313_v43  ;;  %v318_v51 = vrot.slane %v2460_v47, 1  ;;  %v315_v53 = vrot.slane %v2463_v48, 1  ;;  %v321_v58 = vrot.slane %v2479_v54, 1  ;;  %v2501_v62 = vld [vmem:[%s2342_s17 + $0xc8] sm:$0xff]  ;;  %v2504_v63 = vld [vmem:[%s2342_s17 + $0xd0] sm:$0x3] }
  0x1b   : > { %v2475_v52 = vsel %vm284_vm0, %v310_v45, %v311_v42  ;;  %v323_v59 = vrot.slane %v2482_v55, 1  ;;  %v320_v61 = vrot.slane %v2485_v56, 1  ;;  %v2507_v3 = vld [vmem:[%s2342_s17 + $0xc0] sm:$0xff]  ;;  %v326_v6 = vrot.slane %v2501_v62, 1  ;;  %v2526_v18 = vld [vmem:[%s2342_s17 + $0xe8] sm:$0x3] }
  0x1c   : > { %v2492_v57 = vsel %vm284_vm0, %v316_v50, %v318_v51  ;;  %v2497_v60 = vsel %vm284_vm0, %v315_v53, %v316_v50  ;;  %v328_v8 = vrot.slane %v2504_v63, 1  ;;  %v325_v13 = vrot.slane %v2507_v3, 1  ;;  %v2523_v16 = vld [vmem:[%s2342_s17 + $0xe0] sm:$0xff]  ;;  %v2529_v19 = vld [vmem:[%s2342_s17 + $0xd8] sm:$0xff]  ;;  %v2551_v37 = vld [vmem:[%s2342_s17 + $0xf0] sm:$0xff] }
  0x1d   : > { %482 = vrot.lane.b32.xlu1 %v2404_v25, %s2300_s18  ;;  %v2514_v4 = vsel %vm284_vm0, %v321_v58, %v323_v59  ;;  %v2519_v9 = vsel %vm284_vm0, %v320_v61, %v321_v58  ;;  %v331_v21 = vrot.slane %v2523_v16, 1  ;;  %v333_v26 = vrot.slane %v2526_v18, 1  ;;  %v2545_v34 = vld [vmem:[%s2342_s17 + $0xf8] sm:$0xff]  ;;  %v2548_v35 = vld [vmem:[%s2342_s17 + $0x100] sm:$0x3]  ;;  %4023 = vst [vmem:[#allocation4_spill] sm:$0xff] %v2551_v37 }
  0x1e   : > { %480 = vrot.lane.b32.xlu0 %v2409_v28, %s2300_s18  ;;  %v2536_v20 = vsel %vm284_vm0, %v326_v6, %v328_v8  ;;  %v2541_v27 = vsel %vm284_vm0, %v325_v13, %v326_v6  ;;  %v330_v29 = vrot.slane %v2529_v19, 1  ;;  %4021 = vst [vmem:[#allocation2_spill] sm:$0xff] %v2545_v34  ;;  %4022 = vst [vmem:[#allocation3_spill] sm:$0xff] %v2548_v35  ;;  %v336_v43 = vrot.slane %v2545_v34, 1  ;;  %v2567_v53 = vld [vmem:[%s2342_s17 + $0x110] sm:$0xff]  ;;  %v2571_v59 = vld [vmem:[%s2342_s17 + $0x108] sm:$0xff] }
  0x1f   : > { %v2558_v42 = vsel %vm284_vm0, %v331_v21, %v333_v26  ;;  %v338_v45 = vrot.slane %v2548_v35, 1  ;;  %v335_v51 = vrot.slane %v2551_v37, 1  ;;  %4024 = vst [vmem:[#allocation5_spill] sm:$0xff] %v2567_v53  ;;  %v217_v58 = vld [vmem:[%s2342_s17 + $0x118] sm:$0x3]  ;;  %4025 = vst [vmem:[#allocation6_spill] sm:$0xff] %v2571_v59 }
  0x20   : > { %v2563_v50 = vsel %vm284_vm0, %v330_v29, %v331_v21  ;;  %v341_v6 = vrot.slane %v2567_v53, 1  ;;  %v343_v8 = vrot.slane %v217_v58, 1  ;;  %v340_v21 = vrot.slane %v2571_v59, 1  ;;  %v219_v26 = vld [vmem:[%s2342_s17 + $0x128] sm:$0xff]  ;;  %v220_v29 = vld [vmem:[%s2342_s17 + $0x130] sm:$0x3] }
  0x21   : > { %486 = vrot.lane.b32.xlu1 %v2426_v33, %s2300_s18  ;;  %v2578_v61 = vsel %vm284_vm0, %v336_v43, %v338_v45  ;;  %v2582_v13 = vsel %vm284_vm0, %v335_v51, %v336_v43  ;;  %v218_v35 = vld [vmem:[%s2342_s17 + $0x120] sm:$0xff]  ;;  %v346_v58 = vrot.slane %v219_v26, 1  ;;  %v348_v43 = vrot.slane %v220_v29, 1  ;;  %v223_v34 = vld [vmem:[%s2342_s17 + $0x148] sm:$0x3]  ;;  %v221_v37 = vld [vmem:[%s2342_s17 + $0x138] sm:$0xff] }
  0x22   : > { %484 = vrot.lane.b32.xlu0 %v2431_v36, %s2300_s18  ;;  %4026 = vst [vmem:[#allocation7_spill] sm:$0xff] %v2578_v61  ;;  %4027 = vst [vmem:[#allocation8_spill] sm:$0xff] %v2582_v13  ;;  %v2593_v45 = vsel %vm284_vm0, %v341_v6, %v343_v8  ;;  %v2596_v51 = vsel %vm284_vm0, %v340_v21, %v341_v6  ;;  %v345_v53 = vrot.slane %v218_v35, 1  ;;  %v222_v59 = vld [vmem:[%s2342_s17 + $0x140] sm:$0xff]  ;;  %v353_v29 = vrot.slane %v223_v34, 1  ;;  %v225_v21 = vld [vmem:[%s2342_s17 + $0x158] sm:$0xff] }
  0x23   : > { %4028 = vst [vmem:[#allocation9_spill] sm:$0xff] %v2593_v45  ;;  %4029 = vst [vmem:[#allocation10_spill] sm:$0xff] %v2596_v51  ;;  %v2606_v8 = vsel %vm284_vm0, %v346_v58, %v348_v43  ;;  %v351_v26 = vrot.slane %v222_v59, 1  ;;  %v350_v35 = vrot.slane %v221_v37, 1  ;;  %v229_v37 = vld [vmem:[%s2342_s17 + $0x178] sm:$0x3] }
  0x24   : > { %4030 = vst [vmem:[#allocation11_spill] sm:$0xff] %v2606_v8  ;;  %v2609_v6 = vsel %vm284_vm0, %v345_v53, %v346_v58  ;;  %v228_v58 = vld [vmem:[%s2342_s17 + $0x170] sm:$0xff] }
  0x25   : > { %490 = vrot.lane.b32.xlu1 %v2448_v41, %s2300_s18  ;;  %4031 = vst [vmem:[#allocation12_spill] sm:$0xff] %v2609_v6  ;;  %v2619_v43 = vsel %vm284_vm0, %v351_v26, %v353_v29  ;;  %v2622_v34 = vsel %vm284_vm0, %v350_v35, %v351_v26  ;;  %v361_v29 = vrot.slane %v228_v58, 1  ;;  %v367_v35 = vrot.slane %v2356_v5, 2 }
  0x26   : > { %488 = vrot.lane.b32.xlu0 %v2453_v44, %s2300_s18  ;;  %4032 = vst [vmem:[#allocation13_spill] sm:$0xff] %v2619_v43  ;;  %4033 = vst [vmem:[#allocation14_spill] sm:$0xff] %v2622_v34  ;;  %v371_v58 = vrot.slane %v2345_v0, 2 }
  0x29   : > { %494 = vrot.lane.b32.xlu1 %v2470_v49, %s2300_s18 }
  0x2a   : > { %492 = vrot.lane.b32.xlu0 %v2475_v52, %s2300_s18 }
  0x2d   : > { %498 = vrot.lane.b32.xlu1 %v2492_v57, %s2300_s18 }
  0x2e   : > { %496 = vrot.lane.b32.xlu0 %v2497_v60, %s2300_s18 }
  0x31   : > { %502 = vrot.lane.b32.xlu1 %v2514_v4, %s2300_s18 }
  0x32   : > { %500 = vrot.lane.b32.xlu0 %v2519_v9, %s2300_s18 }
  0x35   : > { %506 = vrot.lane.b32.xlu1 %v2536_v20, %s2300_s18 }
  0x36   : > { %504 = vrot.lane.b32.xlu0 %v2541_v27, %s2300_s18 }
  0x39   : > { %510 = vrot.lane.b32.xlu1 %v2558_v42, %s2300_s18 }
  0x3a   : > { %508 = vrot.lane.b32.xlu0 %v2563_v50, %s2300_s18 }
  0x3d   : > { %514 = vrot.lane.b32.xlu1 %v2578_v61, %s2300_s18  ;;  %v226_v61 = vld [vmem:[%s2342_s17 + $0x160] sm:$0x3] }
  0x3e   : > { %512 = vrot.lane.b32.xlu0 %v2582_v13, %s2300_s18  ;;  %v224_v13 = vld [vmem:[%s2342_s17 + $0x150] sm:$0xff]  ;;  %v358_v59 = vrot.slane %v226_v61, 1 }
  0x3f   : > { %v355_v53 = vrot.slane %v224_v13, 1 }
  0x41   : > { %518 = vrot.lane.b32.xlu1 %v2593_v45, %s2300_s18  ;;  %v356_v45 = vrot.slane %v225_v21, 1  ;;  %v369_v21 = vrot.slane %v2365_v10, 2 }
  0x42   : > { %516 = vrot.lane.b32.xlu0 %v2596_v51, %s2300_s18  ;;  %v227_v51 = vld [vmem:[%s2342_s17 + $0x168] sm:$0xff] }
  0x43   : > { %v2635_v61 = vsel %vm284_vm0, %v355_v53, %v356_v45  ;;  %v360_v26 = vrot.slane %v227_v51, 1  ;;  %v370_v51 = vsel %vm365_vm1, %v367_v35, %v369_v21  ;;  %v374_v53 = vrot.slane %v2360_v7, 2 }
  0x44   : > { %4035 = vst [vmem:[#allocation16_spill] sm:$0xff] %v2635_v61 }
  0x45   : > { %522 = vrot.lane.b32.xlu1 %v2606_v8, %s2300_s18  ;;  %v2632_v8 = vsel %vm284_vm0, %v356_v45, %v358_v59  ;;  %v2647_v59 = vsel %vm284_vm0, %v360_v26, %v361_v29  ;;  %v366_v45 = vrot.slane %v2351_v2, 2  ;;  %v379_v26 = vrot.slane %v2375_v14, 2 }
  0x46   : > { %520 = vrot.lane.b32.xlu0 %v2609_v6, %s2300_s18  ;;  %4034 = vst [vmem:[#allocation15_spill] sm:$0xff] %v2632_v8  ;;  %v363_v6 = vrot.slane %v229_v37, 1  ;;  %4037 = vst [vmem:[#allocation18_spill] sm:$0xff] %v2647_v59  ;;  %v381_v14 = vrot.slane %v2398_v24, 2 }
  0x47   : > { %v368_v10 = vsel %vm365_vm1, %v366_v45, %v367_v35  ;;  %v382_v35 = vrot.slane %v2392_v22, 2  ;;  %v384_v45 = vrot.slane %v2395_v23, 2 }
  0x48   : > { %v2642_v13 = vsel %vm284_vm0, %v361_v29, %v363_v6  ;;  %v372_v6 = vrot.slane %v2348_v1, 2  ;;  %v377_v29 = vrot.slane %v2368_v11, 2 }
  0x49   : > { %526 = vrot.lane.b32.xlu1 %v2619_v43, %s2300_s18  ;;  %4036 = vst [vmem:[#allocation17_spill] sm:$0xff] %v2642_v13  ;;  %v2687_v23 = vsel %vm365_vm1, %v381_v14, %v382_v35  ;;  %v397_v14 = vrot.slane %v2457_v46, 2 }
  0x4a   : > { %524 = vrot.lane.b32.xlu0 %v2622_v34, %s2300_s18  ;;  %v375_v37 = vsel %vm365_vm1, %v372_v6, %v374_v53  ;;  %v373_v21 = vsel %vm365_vm1, %v371_v58, %v372_v6  ;;  %v2669_v7 = vsel %vm365_vm1, %v377_v29, %v379_v26  ;;  %v2682_v6 = vsel %vm365_vm1, %v382_v35, %v384_v45 }
  0x4b   : > { %v387_v53 = vrot.slane %v2413_v30, 2  ;;  %v394_v26 = vrot.slane %v2438_v39, 2  ;;  %v391_v35 = vrot.slane %v2441_v40, 2 }
  0x4d   : > { %530 = vrot.lane.b32.xlu1 %v2632_v8, %s2300_s18 }
  0x4e   : > { %528 = vrot.lane.b32.xlu0 %v2635_v61, %s2300_s18 }
  0x51   : > { %534 = vrot.lane.b32.xlu1 %v2642_v13, %s2300_s18  ;;  %v376_v13 = vrot.slane %v2378_v15, 2 }
  0x52   : > { %532 = vrot.lane.b32.xlu0 %v2647_v59, %s2300_s18  ;;  %v404_v59 = vrot.slane %v2482_v55, 2  ;;  %v1508_v55 = vld [vmem:[%s3985_s1 + $0x20] sm:$0xf]  ;;  %s181_s18 = scalar_lea.vmem %s3987_s3, %s2103_s15 }
  0x53   : > { %2177 = vmatprep.subr.msk.mxu0 %vm1606_vm2, %v1508_v55  ;;  %2235 = vmatprep.subr.msk.mxu1 %vm1606_vm2, %v1508_v55 }
  0x54   : > { %2178 = vmatpush3.msk.msra.mxu0 %vm1606_vm2, %v1508_v55  ;;  %2240 = vmatpush3.msk.msra.mxu1 %vm1606_vm2, %v1508_v55 }
  0x55   : > { %570 = vrot.lane.b32.xlu1 %v370_v51, %s2301_s19  ;;  %v2674_v51 = vsel %vm365_vm1, %v376_v13, %v377_v29  ;;  %v386_v13 = vrot.slane %v2419_v32, 2  ;;  %v392_v29 = vrot.slane %v2435_v38, 2 }
  0x56   : > { %568 = vrot.lane.b32.xlu0 %v368_v10, %s2301_s19  ;;  %v389_v10 = vrot.slane %v2416_v31, 2 }
  0x57   : > { %v2700_v31 = vsel %vm365_vm1, %v386_v13, %v387_v53  ;;  %v2708_v45 = vsel %vm365_vm1, %v392_v29, %v394_v26  ;;  %v2713_v39 = vsel %vm365_vm1, %v391_v35, %v392_v29  ;;  %v402_v26 = vrot.slane %v2479_v54, 2 }
  0x58   : > { %v2695_v58 = vsel %vm365_vm1, %v387_v53, %v389_v10  ;;  %v399_v10 = vrot.slane %v2460_v47, 2  ;;  %v396_v53 = vrot.slane %v2463_v48, 2  ;;  %v401_v29 = vrot.slane %v2485_v56, 2 }
  0x59   : > { %574 = vrot.lane.b32.xlu1 %v375_v37, %s2301_s19  ;;  %v2734_v35 = vsel %vm365_vm1, %v402_v26, %v404_v59  ;;  %v1505_v59 = vld [vmem:[%s3985_s1 + $0x8] sm:$0xff] }
  0x5a   : > { %572 = vrot.lane.b32.xlu0 %v373_v21, %s2301_s19  ;;  %v2721_v13 = vsel %vm365_vm1, %v397_v14, %v399_v10  ;;  %v2726_v47 = vsel %vm365_vm1, %v396_v53, %v397_v14  ;;  %v2737_v10 = vsel %vm365_vm1, %v401_v29, %v402_v26 }
  0x5d   : > { %578 = vrot.lane.b32.xlu1 %v2669_v7, %s2301_s19 }
  0x5e   : > { %576 = vrot.lane.b32.xlu0 %v2674_v51, %s2301_s19 }
  0x61   : > { %582 = vrot.lane.b32.xlu1 %v2682_v6, %s2301_s19 }
  0x62   : > { %580 = vrot.lane.b32.xlu0 %v2687_v23, %s2301_s19 }
  0x65   : > { %586 = vrot.lane.b32.xlu1 %v2695_v58, %s2301_s19 }
  0x66   : > { %584 = vrot.lane.b32.xlu0 %v2700_v31, %s2301_s19 }
  0x69   : > { %590 = vrot.lane.b32.xlu1 %v2708_v45, %s2301_s19 }
  0x6a   : > { %588 = vrot.lane.b32.xlu0 %v2713_v39, %s2301_s19 }
  0x6d   : > { %594 = vrot.lane.b32.xlu1 %v2721_v13, %s2301_s19 }
  0x6e   : > { %592 = vrot.lane.b32.xlu0 %v2726_v47, %s2301_s19 }
  0x71   : > { %598 = vrot.lane.b32.xlu1 %v2734_v35, %s2301_s19 }
  0x72   : > { %596 = vrot.lane.b32.xlu0 %v2737_v10, %s2301_s19 }
  0x75   : > { %666 = vrot.lane.b32.xlu1 %v2348_v1, %s2302_s20 }
  0x76   : > { %664 = vrot.lane.b32.xlu0 %v2345_v0, %s2302_s20 }
  0x79   : > { %762 = vrot.lane.b32.xlu1 %v2385_v17, %s2303_s21  ;;  %v1506_v17 = vld [vmem:[%s3985_s1 + $0x10] sm:$0xff] }
  0x7a   : > { %760 = vrot.lane.b32.xlu0 %v2371_v12, %s2303_s21  ;;  %v1507_v12 = vld [vmem:[%s3985_s1 + $0x18] sm:$0xff] }
  0x7b   : > { %2179 = vmatprep.subr.mxu0 %v1507_v12  ;;  %2236 = vmatprep.subr.mxu1 %v1507_v12 }
  0x7c   : > { %2180 = vmatpush3.msra.mxu0 %v1507_v12  ;;  %2241 = vmatpush3.msra.mxu1 %v1507_v12 }
  0x7d   : > { %858 = vrot.lane.b32.xlu1 %v375_v37, %s2304_s22  ;;  %2181 = vmatprep.subr.mxu0 %v1506_v17  ;;  %v1504_v37 = vld [vmem:[%s3985_s1] sm:$0xff] }
  0x7e   : > { %856 = vrot.lane.b32.xlu0 %v373_v21, %s2304_s22  ;;  %2182 = vmatpush3.msra.mxu0 %v1506_v17 }
  0x7f   : > { %2183 = vmatprep.subr.mxu0 %v1505_v59  ;;  %2237 = vmatprep.subr.mxu1 %v1506_v17 }
  0x80   : > { %2184 = vmatpush3.msra.mxu0 %v1505_v59  ;;  %2242 = vmatpush3.msra.mxu1 %v1506_v17 }
  0x81   : > { %668 = vrot.lane.b32.xlu1 %v2378_v15, %s2302_s20  ;;  %2185 = vmatprep.subr.mxu0 %v1504_v37 }
  0x82   : > { %952 = vrot.lane.b32.xlu0 %v2378_v15, %s2305_s27  ;;  %2186 = vmatpush3.msra.mxu0 %v1504_v37 }
  0x83   : > { %2238 = vmatprep.subr.mxu1 %v1505_v59 }
  0x84   : > { %2243 = vmatpush3.msra.mxu1 %v1505_v59 }
  0x85   : > { %1048 = vrot.lane.b32.xlu1 %v2409_v28, %s2306_s30  ;;  %2239 = vmatprep.subr.mxu1 %v1504_v37 }
  0x86   : > { %954 = vrot.lane.b32.xlu0 %v2368_v11, %s2305_s27  ;;  %2244 = vmatpush3.msra.mxu1 %v1504_v37 }
  0x87   : > { %v2776_v21 = vpop.permute.xlu1 %476 }
  0x88   : > { %v2778_v14 = vpop.permute.xlu0 %472 }
  0x89   : > { %764 = vrot.lane.b32.xlu1 %v2409_v28, %s2303_s21 }
  0x8a   : > { %670 = vrot.lane.b32.xlu0 %v2368_v11, %s2302_s20 }
  0x8b   : > { %v2784_v53 = vpop.permute.xlu1 %478 }
  0x8c   : > { %v2786_v26 = vpop.permute.xlu0 %474 }
  0x8d   : > { %1144 = vrot.lane.b32.xlu1 %v2674_v51, %s2307_s8 }
  0x8e   : > { %1050 = vrot.lane.b32.xlu0 %v2404_v25, %s2306_s30 }
  0x8f   : > { %v2792_v28 = vpop.permute.xlu1 %482 }
  0x90   : > { %v2794_v29 = vpop.permute.xlu0 %480 }
  0x91   : > { %860 = vrot.lane.b32.xlu1 %v2674_v51, %s2304_s22 }
  0x92   : > { %766 = vrot.lane.b32.xlu0 %v2404_v25, %s2303_s21 }
  0x93   : > { %v2800_v55 = vpop.permute.xlu1 %486 }
  0x94   : > { %v2802_v12 = vpop.permute.xlu0 %484 }
  0x95   : > { %862 = vrot.lane.b32.xlu1 %v2669_v7, %s2304_s22 }
  0x96   : > { %1146 = vrot.lane.b32.xlu0 %v2669_v7, %s2307_s8 }
  0x97   : > { %v2808_v17 = vpop.permute.xlu1 %490 }
  0x98   : > { %v2810_v59 = vpop.permute.xlu0 %488 }
  0x99   : > { %672 = vrot.lane.b32.xlu1 %v2398_v24, %s2302_s20 }
  0x9a   : > { %956 = vrot.lane.b32.xlu0 %v2398_v24, %s2305_s27 }
  0x9b   : > { %v2816_v25 = vpop.permute.xlu1 %494 }
  0x9c   : > { %v2818_v51 = vpop.permute.xlu0 %492 }
  0x9d   : > { %1052 = vrot.lane.b32.xlu1 %v2431_v36, %s2306_s30 }
  0x9e   : > { %958 = vrot.lane.b32.xlu0 %v2392_v22, %s2305_s27 }
  0x9f   : > { %v2824_v7 = vpop.permute.xlu1 %498 }
  0xa0   : > { %4038 = vst [vmem:[#allocation19_spill] sm:$0xff] %v2824_v7  ;;  %v2826_v37 = vpop.permute.xlu0 %496 }
  0xa1   : > { %768 = vrot.lane.b32.xlu1 %v2431_v36, %s2303_s21 }
  0xa2   : > { %674 = vrot.lane.b32.xlu0 %v2392_v22, %s2302_s20 }
  0xa3   : > { %v2832_v8 = vpop.permute.xlu1 %502 }
  0xa4   : > { %4039 = vst [vmem:[#allocation20_spill] sm:$0xff] %v2832_v8  ;;  %v2834_v61 = vpop.permute.xlu0 %500 }
  0xa5   : > { %4040 = vst [vmem:[#allocation21_spill] sm:$0xff] %v2834_v61  ;;  %1148 = vrot.lane.b32.xlu1 %v2687_v23, %s2307_s8 }
  0xa6   : > { %1054 = vrot.lane.b32.xlu0 %v2426_v33, %s2306_s30 }
  0xa7   : > { %v2840_v43 = vpop.permute.xlu1 %506 }
  0xa8   : > { %4041 = vst [vmem:[#allocation22_spill] sm:$0xff] %v2840_v43  ;;  %v2842_v34 = vpop.permute.xlu0 %504 }
  0xa9   : > { %4042 = vst [vmem:[#allocation23_spill] sm:$0xff] %v2842_v34  ;;  %864 = vrot.lane.b32.xlu1 %v2687_v23, %s2304_s22 }
  0xaa   : > { %770 = vrot.lane.b32.xlu0 %v2426_v33, %s2303_s21 }
  0xab   : > { %v2848_v22 = vpop.permute.xlu1 %510 }
  0xac   : > { %4043 = vst [vmem:[#allocation24_spill] sm:$0xff] %v2848_v22  ;;  %v2850_v36 = vpop.permute.xlu0 %508 }
  0xad   : > { %4044 = vst [vmem:[#allocation25_spill] sm:$0xff] %v2850_v36  ;;  %866 = vrot.lane.b32.xlu1 %v2682_v6, %s2304_s22 }
  0xae   : > { %1150 = vrot.lane.b32.xlu0 %v2682_v6, %s2307_s8 }
  0xaf   : > { %v2856_v8 = vpop.permute.xlu1 %514 }
  0xb0   : > { %4045 = vst [vmem:[#allocation26_spill] sm:$0xff] %v2856_v8  ;;  %v2858_v43 = vpop.permute.xlu0 %512 }
  0xb1   : > { %4046 = vst [vmem:[#allocation27_spill] sm:$0xff] %v2858_v43  ;;  %676 = vrot.lane.b32.xlu1 %v2419_v32, %s2302_s20 }
  0xb2   : > { %960 = vrot.lane.b32.xlu0 %v2419_v32, %s2305_s27 }
  0xb3   : > { %v2864_v33 = vpop.permute.xlu1 %518 }
  0xb4   : > { %4047 = vst [vmem:[#allocation28_spill] sm:$0xff] %v2864_v33  ;;  %v2866_v23 = vpop.permute.xlu0 %516 }
  0xb5   : > { %4048 = vst [vmem:[#allocation29_spill] sm:$0xff] %v2866_v23  ;;  %1056 = vrot.lane.b32.xlu1 %v2453_v44, %s2306_s30 }
  0xb6   : > { %962 = vrot.lane.b32.xlu0 %v2413_v30, %s2305_s27 }
  0xb7   : > { %v2872_v6 = vpop.permute.xlu1 %522 }
  0xb8   : > { %4049 = vst [vmem:[#allocation30_spill] sm:$0xff] %v2872_v6  ;;  %v2874_v8 = vpop.permute.xlu0 %520 }
  0xb9   : > { %4050 = vst [vmem:[#allocation31_spill] sm:$0xff] %v2874_v8  ;;  %772 = vrot.lane.b32.xlu1 %v2453_v44, %s2303_s21 }
  0xba   : > { %678 = vrot.lane.b32.xlu0 %v2413_v30, %s2302_s20 }
  0xbb   : > { %v2880_v32 = vpop.permute.xlu1 %526 }
  0xbc   : > { %4051 = vst [vmem:[#allocation32_spill] sm:$0xff] %v2880_v32  ;;  %v2882_v33 = vpop.permute.xlu0 %524 }
  0xbd   : > { %4052 = vst [vmem:[#allocation33_spill] sm:$0xff] %v2882_v33  ;;  %1152 = vrot.lane.b32.xlu1 %v2700_v31, %s2307_s8 }
  0xbe   : > { %1058 = vrot.lane.b32.xlu0 %v2448_v41, %s2306_s30 }
  0xbf   : > { %v2888_v23 = vpop.permute.xlu1 %530 }
  0xc0   : > { %4053 = vst [vmem:[#allocation34_spill] sm:$0xff] %v2888_v23  ;;  %v2890_v6 = vpop.permute.xlu0 %528 }
  0xc1   : > { %4054 = vst [vmem:[#allocation35_spill] sm:$0xff] %v2890_v6  ;;  %868 = vrot.lane.b32.xlu1 %v2700_v31, %s2304_s22 }
  0xc2   : > { %774 = vrot.lane.b32.xlu0 %v2448_v41, %s2303_s21 }
  0xc3   : > { %v2896_v30 = vpop.permute.xlu1 %534 }
  0xc4   : > { %4055 = vst [vmem:[#allocation36_spill] sm:$0xff] %v2896_v30  ;;  %v2898_v44 = vpop.permute.xlu0 %532 }
  0xc5   : > { %4056 = vst [vmem:[#allocation37_spill] sm:$0xff] %v2898_v44  ;;  %870 = vrot.lane.b32.xlu1 %v2695_v58, %s2304_s22 }
  0xc6   : > { %1154 = vrot.lane.b32.xlu0 %v2695_v58, %s2307_s8 }
  0xc7   : > { %v2904_v32 = vpop.permute.xlu1 %570 }
  0xc8   : > { %v569_v23 = vpop.permute.xlu0 %568 }
  0xc9   : > { %680 = vrot.lane.b32.xlu1 %v2441_v40, %s2302_s20 }
  0xca   : > { %964 = vrot.lane.b32.xlu0 %v2441_v40, %s2305_s27 }
  0xcb   : > { %v2910_v41 = vpop.permute.xlu1 %574 }
  0xcc   : > { %v2912_v31 = vpop.permute.xlu0 %572 }
  0xcd   : > { %1060 = vrot.lane.b32.xlu1 %v2475_v52, %s2306_s30 }
  0xce   : > { %966 = vrot.lane.b32.xlu0 %v2435_v38, %s2305_s27 }
  0xcf   : > { %v2918_v58 = vpop.permute.xlu1 %578 }
  0xd0   : > { %v2920_v44 = vpop.permute.xlu0 %576 }
  0xd1   : > { %776 = vrot.lane.b32.xlu1 %v2475_v52, %s2303_s21 }
  0xd2   : > { %682 = vrot.lane.b32.xlu0 %v2435_v38, %s2302_s20 }
  0xd3   : > { %v2926_v40 = vpop.permute.xlu1 %582 }
  0xd4   : > { %v2928_v30 = vpop.permute.xlu0 %580 }
  0xd5   : > { %1156 = vrot.lane.b32.xlu1 %v2713_v39, %s2307_s8 }
  0xd6   : > { %1062 = vrot.lane.b32.xlu0 %v2470_v49, %s2306_s30 }
  0xd7   : > { %v2934_v6 = vpop.permute.xlu1 %586 }
  0xd8   : > { %v2936_v33 = vpop.permute.xlu0 %584 }
  0xd9   : > { %872 = vrot.lane.b32.xlu1 %v2713_v39, %s2304_s22 }
  0xda   : > { %778 = vrot.lane.b32.xlu0 %v2470_v49, %s2303_s21 }
  0xdb   : > { %v2942_v38 = vpop.permute.xlu1 %590 }
  0xdc   : > { %v2944_v52 = vpop.permute.xlu0 %588 }
  0xdd   : > { %874 = vrot.lane.b32.xlu1 %v2708_v45, %s2304_s22 }
  0xde   : > { %1158 = vrot.lane.b32.xlu0 %v2708_v45, %s2307_s8 }
  0xdf   : > { %v2950_v8 = vpop.permute.xlu1 %594 }
  0xe0   : > { %4057 = vst [vmem:[#allocation38_spill] sm:$0xff] %v2950_v8  ;;  %v2952_v43 = vpop.permute.xlu0 %592 }
  0xe1   : > { %4058 = vst [vmem:[#allocation39_spill] sm:$0xff] %v2952_v43  ;;  %684 = vrot.lane.b32.xlu1 %v2463_v48, %s2302_s20 }
  0xe2   : > { %968 = vrot.lane.b32.xlu0 %v2463_v48, %s2305_s27 }
  0xe3   : > { %v2958_v49 = vpop.permute.xlu1 %598 }
  0xe4   : > { %4059 = vst [vmem:[#allocation40_spill] sm:$0xff] %v2958_v49  ;;  %v2960_v39 = vpop.permute.xlu0 %596 }
  0xe5   : > { %4060 = vst [vmem:[#allocation41_spill] sm:$0xff] %v2960_v39  ;;  %1064 = vrot.lane.b32.xlu1 %v2497_v60, %s2306_s30 }
  0xe6   : > { %970 = vrot.lane.b32.xlu0 %v2457_v46, %s2305_s27 }
  0xe7   : > { %v667_v45 = vpop.permute.xlu1 %666 }
  0xe8   : > { %v665_v22 = vpop.permute.xlu0 %664 }
  0xe9   : > { %780 = vrot.lane.b32.xlu1 %v2497_v60, %s2303_s21 }
  0xea   : > { %686 = vrot.lane.b32.xlu0 %v2457_v46, %s2302_s20 }
  0xeb   : > { %v763_v36 = vpop.permute.xlu1 %762 }
  0xec   : > { %v761_v48 = vpop.permute.xlu0 %760 }
  0xed   : > { %1160 = vrot.lane.b32.xlu1 %v2726_v47, %s2307_s8 }
  0xee   : > { %1066 = vrot.lane.b32.xlu0 %v2492_v57, %s2306_s30 }
  0xef   : > { %v859_v34 = vpop.permute.xlu1 %858 }
  0xf0   : > { %v857_v49 = vpop.permute.xlu0 %856 }
  0xf1   : > { %876 = vrot.lane.b32.xlu1 %v2726_v47, %s2304_s22  ;;  %v1241_v47 = vsel %vm1240_vm3, %v2351_v2, %v2778_v14 }
  0xf2   : > { %782 = vrot.lane.b32.xlu0 %v2492_v57, %s2303_s21  ;;  %v1274_v57 = vsel %vm1273_vm4, %v1241_v47, %v569_v23 }
  0xf3   : > { %v669_v60 = vpop.permute.xlu1 %668 }
  0xf4   : > { %v953_v39 = vpop.permute.xlu0 %952 }
  0xf5   : > { %878 = vrot.lane.b32.xlu1 %v2721_v13, %s2304_s22 }
  0xf6   : > { %1162 = vrot.lane.b32.xlu0 %v2721_v13, %s2307_s8  ;;  %v1307_v13 = vsel %vm1306_vm5, %v1274_v57, %v665_v22 }
  0xf7   : > { %v1049_v46 = vpop.permute.xlu1 %1048  ;;  %v1340_v7 = vsel %vm1339_vm6, %v1307_v13, %v761_v48 }
  0xf8   : > { %v955_v61 = vpop.permute.xlu0 %954  ;;  %v1373_v2 = vsel %vm1372_vm7, %v1340_v7, %v857_v49  ;;  %v1242_v7 = vsel %vm1240_vm3, %v2356_v5, %v2786_v26 }
  0xf9   : > { %688 = vrot.lane.b32.xlu1 %v2485_v56, %s2302_s20  ;;  %v1406_v14 = vsel %vm1405_vm8, %v1373_v2, %v953_v39  ;;  %v1275_v49 = vsel %vm1273_vm4, %v1242_v7, %v2904_v32  ;;  %v1243_v2 = vsel %vm1240_vm3, %v2345_v0, %v2776_v21  ;;  %v406_v21 = vrot.slane %v2507_v3, 2 }
  0xfa   : > { %972 = vrot.lane.b32.xlu0 %v2485_v56, %s2305_s27  ;;  %v1439_v56 = vsel %vm1438_vm9, %v1406_v14, %v1049_v46  ;;  %v1308_v46 = vsel %vm1306_vm5, %v1275_v49, %v667_v45  ;;  %v1244_v7 = vsel %vm1240_vm3, %v2348_v1, %v2784_v53  ;;  %v409_v53 = vrot.slane %v2504_v63, 2 }
  0xfb   : > { %v765_v8 = vpop.permute.xlu1 %764  ;;  %v1341_v57 = vsel %vm1339_vm6, %v1308_v46, %v763_v36  ;;  %v1277_v49 = vsel %vm1273_vm4, %v1244_v7, %v2910_v41 }
  0xfc   : > { %v2992_v43 = vpop.permute.xlu0 %670 }
  0xfd   : > { %1068 = vrot.lane.b32.xlu1 %v2519_v9, %s2306_s30  ;;  %v1310_v46 = vsel %vm1306_vm5, %v1277_v49, %v2992_v43 }
  0xfe   : > { %974 = vrot.lane.b32.xlu0 %v2479_v54, %s2305_s27 }
  0xff   : > { %v1145_v22 = vpop.permute.xlu1 %1144 }
 0x100   : > { %v1051_v23 = vpop.permute.xlu0 %1050  ;;  %v1472_v48 = vsel %vm1471_vm10, %v1439_v56, %v1145_v22 }
 0x101   : > { %784 = vrot.lane.b32.xlu1 %v2519_v9, %s2303_s21  ;;  %2187 = vmatprep.mubr.msk.f32.mxu0 %vm1509_vm11, %v1472_v48  ;;  %v1374_v9 = vsel %vm1372_vm7, %v1341_v57, %v859_v34 }
 0x102   : > { %690 = vrot.lane.b32.xlu0 %v2479_v54, %s2302_s20  ;;  %v1407_v5 = vsel %vm1405_vm8, %v1374_v9, %v955_v61 }
 0x103   : > { %v861_v39 = vpop.permute.xlu1 %860  ;;  %v1440_v26 = vsel %vm1438_vm9, %v1407_v5, %v1051_v23 }
 0x104   : > { %v767_v47 = vpop.permute.xlu0 %766 }
 0x105   : > { %1164 = vrot.lane.b32.xlu1 %v2737_v10, %s2307_s8 }
 0x106   : > { %1070 = vrot.lane.b32.xlu0 %v2514_v4, %s2306_s30 }
 0x107   : > { %v863_v54 = vpop.permute.xlu1 %862 }
 0x108   : > { %v1147_v32 = vpop.permute.xlu0 %1146 }
 0x109   : > { %v1473_v13 = vsel %vm1471_vm10, %v1440_v26, %v1147_v32  ;;  %880 = vrot.lane.b32.xlu1 %v2737_v10, %s2304_s22 }
 0x10a   : > { %786 = vrot.lane.b32.xlu0 %v2514_v4, %s2303_s21  ;;  %2188 = vmatmul.mubr.msk.f32.vlgmr.msra.gmra.mxu0 %vm1509_vm11, %v1473_v13  ;;  %v1276_v4 = vsel %vm1273_vm4, %v1243_v2, %v2912_v31  ;;  %v407_v31 = vrot.slane %v2501_v62, 2  ;;  %v1245_v13 = vsel %vm1240_vm3, %v2378_v15, %v2794_v29 }
 0x10b   : > { %v673_v34 = vpop.permute.xlu1 %672  ;;  %v1309_v10 = vsel %vm1306_vm5, %v1276_v4, %v669_v60 }
 0x10c   : > { %v957_v36 = vpop.permute.xlu0 %956 }
 0x10d   : > { %882 = vrot.lane.b32.xlu1 %v2734_v35, %s2304_s22 }
 0x10e   : > { %1166 = vrot.lane.b32.xlu0 %v2734_v35, %s2307_s8  ;;  %v1342_v35 = vsel %vm1339_vm6, %v1309_v10, %v765_v8 }
 0x10f   : > { %v1053_v61 = vpop.permute.xlu1 %1052  ;;  %v1375_v22 = vsel %vm1372_vm7, %v1342_v35, %v861_v39  ;;  %v411_v35 = vrot.slane %v2529_v19, 2 }
 0x110   : > { %v959_v45 = vpop.permute.xlu0 %958  ;;  %v1408_v0 = vsel %vm1405_vm8, %v1375_v22, %v957_v36  ;;  %v412_v22 = vrot.slane %v2523_v16, 2 }
 0x111   : > { %692 = vrot.lane.b32.xlu1 %v2507_v3, %s2302_s20  ;;  %v1441_v60 = vsel %vm1438_vm9, %v1408_v0, %v1053_v61 }
 0x112   : > { %976 = vrot.lane.b32.xlu0 %v2507_v3, %s2305_s27  ;;  %v408_v3 = vsel %vm365_vm1, %v406_v21, %v407_v31 }
 0x113   : > { %v769_v14 = vpop.permute.xlu1 %768 }
 0x114   : > { %v3042_v56 = vpop.permute.xlu0 %674 }
 0x115   : > { %1072 = vrot.lane.b32.xlu1 %v2541_v27, %s2306_s30 }
 0x116   : > { %978 = vrot.lane.b32.xlu0 %v2501_v62, %s2305_s27 }
 0x117   : > { %v1149_v23 = vpop.permute.xlu1 %1148 }
 0x118   : > { %v1474_v8 = vsel %vm1471_vm10, %v1441_v60, %v1149_v23  ;;  %v1055_v48 = vpop.permute.xlu0 %1054 }
 0x119   : > { %788 = vrot.lane.b32.xlu1 %v2541_v27, %s2303_s21  ;;  %2190 = vmatprep.mubr.msk.f32.mxu0 %vm1509_vm11, %v1474_v8  ;;  %v1343_v27 = vsel %vm1339_vm6, %v1310_v46, %v767_v47  ;;  %v1247_v46 = vsel %vm1240_vm3, %v2398_v24, %v2802_v12 }
 0x11a   : > { %694 = vrot.lane.b32.xlu0 %v2501_v62, %s2302_s20  ;;  %v1376_v9 = vsel %vm1372_vm7, %v1343_v27, %v863_v54  ;;  %v410_v54 = vsel %vm365_vm1, %v407_v31, %v409_v53 }
 0x11b   : > { %v865_v39 = vpop.permute.xlu1 %864  ;;  %v1409_v1 = vsel %vm1405_vm8, %v1376_v9, %v959_v45 }
 0x11c   : > { %v771_v57 = vpop.permute.xlu0 %770  ;;  %v1442_v41 = vsel %vm1438_vm9, %v1409_v1, %v1055_v48 }
 0x11d   : > { %1168 = vrot.lane.b32.xlu1 %v408_v3, %s2307_s8 }
 0x11e   : > { %1074 = vrot.lane.b32.xlu0 %v2536_v20, %s2306_s30 }
 0x11f   : > { %v867_v62 = vpop.permute.xlu1 %866 }
 0x120   : > { %v1151_v5 = vpop.permute.xlu0 %1150 }
 0x121   : > { %v1475_v43 = vsel %vm1471_vm10, %v1442_v41, %v1151_v5  ;;  %884 = vrot.lane.b32.xlu1 %v408_v3, %s2304_s22  ;;  %v2262_v5 = vld [vmem:[%s2342_s17 + $0x50] sm:$0xff] }
 0x122   : > { %790 = vrot.lane.b32.xlu0 %v2536_v20, %s2303_s21  ;;  %2191 = vmatmul.mubr.msk.f32.gmra.mxu0 %vm1509_vm11, %v1475_v43  ;;  %v1278_v20 = vsel %vm1273_vm4, %v1245_v13, %v2920_v44  ;;  %v1248_v43 = vsel %vm1240_vm3, %v2262_v5, %v2800_v55  ;;  %v4062_v13 = vld [vmem:[#allocation8_spill] sm:$0xff] }
 0x123   : > { %v677_v47 = vpop.permute.xlu1 %676  ;;  %v1311_v36 = vsel %vm1306_vm5, %v1278_v20, %v673_v34 }
 0x124   : > { %v961_v26 = vpop.permute.xlu0 %960  ;;  %v1344_v45 = vsel %vm1339_vm6, %v1311_v36, %v769_v14  ;;  %v1246_v14 = vsel %vm1240_vm3, %v2368_v11, %v2792_v28  ;;  %v4063_v36 = vld [vmem:[#allocation2_spill] sm:$0xff] }
 0x125   : > { %600 = vrot.lane.b32.xlu1 %v408_v3, %s2301_s19  ;;  %v1377_v4 = vsel %vm1372_vm7, %v1344_v45, %v865_v39  ;;  %v1279_v0 = vsel %vm1273_vm4, %v1246_v14, %v2918_v58 }
 0x126   : > { %1170 = vrot.lane.b32.xlu0 %v410_v54, %s2307_s8  ;;  %v1410_v15 = vsel %vm1405_vm8, %v1377_v4, %v961_v26  ;;  %v1312_v31 = vsel %vm1306_vm5, %v1279_v0, %v3042_v56 }
 0x127   : > { %v1057_v63 = vpop.permute.xlu1 %1056  ;;  %v1345_v23 = vsel %vm1339_vm6, %v1312_v31, %v771_v57  ;;  %v1280_v57 = vsel %vm1273_vm4, %v1247_v46, %v2928_v30 }
 0x128   : > { %v963_v32 = vpop.permute.xlu0 %962  ;;  %v1443_v29 = vsel %vm1438_vm9, %v1410_v15, %v1057_v63  ;;  %v1378_v11 = vsel %vm1372_vm7, %v1345_v23, %v867_v62  ;;  %v4061_v62 = vld [vmem:[#allocation4_spill] sm:$0xff] }
 0x129   : > { %980 = vrot.lane.b32.xlu1 %v2529_v19, %s2305_s27  ;;  %v1411_v28 = vsel %vm1405_vm8, %v1378_v11, %v963_v32  ;;  %v416_v55 = vrot.slane %v4061_v62, 2 }
 0x12a   : > { %886 = vrot.lane.b32.xlu0 %v410_v54, %s2304_s22 }
 0x12b   : > { %v773_v61 = vpop.permute.xlu1 %772 }
 0x12c   : > { %v3093_v2 = vpop.permute.xlu0 %678 }
 0x12d   : > { %696 = vrot.lane.b32.xlu1 %v2529_v19, %s2302_s20  ;;  %v413_v19 = vsel %vm365_vm1, %v411_v35, %v412_v22  ;;  %v4065_v35 = vld [vmem:[#allocation3_spill] sm:$0xff] }
 0x12e   : > { %602 = vrot.lane.b32.xlu0 %v410_v54, %s2301_s19 }
 0x12f   : > { %v1153_v44 = vpop.permute.xlu1 %1152 }
 0x130   : > { %v1476_v10 = vsel %vm1471_vm10, %v1443_v29, %v1153_v44  ;;  %v1059_v34 = vpop.permute.xlu0 %1058 }
 0x131   : > { %1076 = vrot.lane.b32.xlu1 %v2563_v50, %s2306_s30  ;;  %2193 = vmatprep.mubr.msk.f32.mxu0 %vm1509_vm11, %v1476_v10  ;;  %v1444_v8 = vsel %vm1438_vm9, %v1411_v28, %v1059_v34  ;;  %v4064_v34 = vld [vmem:[#allocation7_spill] sm:$0xff] }
 0x132   : > { %982 = vrot.lane.b32.xlu0 %v2523_v16, %s2305_s27 }
 0x133   : > { %v869_v21 = vpop.permute.xlu1 %868 }
 0x134   : > { %v775_v60 = vpop.permute.xlu0 %774 }
 0x135   : > { %792 = vrot.lane.b32.xlu1 %v2563_v50, %s2303_s21 }
 0x136   : > { %698 = vrot.lane.b32.xlu0 %v2523_v16, %s2302_s20  ;;  %v414_v16 = vrot.slane %v2526_v18, 2  ;;  %v1313_v18 = vsel %vm1306_vm5, %v1280_v57, %v677_v47  ;;  %v1281_v47 = vsel %vm1273_vm4, %v1248_v43, %v2926_v40 }
 0x137   : > { %v871_v58 = vpop.permute.xlu1 %870  ;;  %v1314_v26 = vsel %vm1306_vm5, %v1281_v47, %v3093_v2 }
 0x138   : > { %v1155_v48 = vpop.permute.xlu0 %1154  ;;  %v415_v49 = vsel %vm365_vm1, %v412_v22, %v414_v16  ;;  %v1347_v32 = vsel %vm1339_vm6, %v1314_v26, %v775_v60  ;;  %v419_v22 = vrot.slane %v4065_v35, 2  ;;  %v4066_v16 = vld [vmem:[#allocation6_spill] sm:$0xff] }
 0x139   : > { %v1477_v56 = vsel %vm1471_vm10, %v1444_v8, %v1155_v48  ;;  %1172 = vrot.lane.b32.xlu1 %v413_v19, %s2307_s8  ;;  %v1380_v20 = vsel %vm1372_vm7, %v1347_v32, %v871_v58  ;;  %v4069_v32 = vld [vmem:[#allocation9_spill] sm:$0xff] }
 0x13a   : > { %1078 = vrot.lane.b32.xlu0 %v2558_v42, %s2306_s30  ;;  %2194 = vmatmul.mubr.msk.f32.gmra.mxu0 %vm1509_vm11, %v1477_v56 }
 0x13b   : > { %v681_v50 = vpop.permute.xlu1 %680 }
 0x13c   : > { %v965_v7 = vpop.permute.xlu0 %964 }
 0x13d   : > { %888 = vrot.lane.b32.xlu1 %v413_v19, %s2304_s22 }
 0x13e   : > { %794 = vrot.lane.b32.xlu0 %v2558_v42, %s2303_s21  ;;  %v1346_v42 = vsel %vm1339_vm6, %v1313_v18, %v773_v61  ;;  %v417_v61 = vrot.slane %v4063_v36, 2 }
 0x13f   : > { %v1061_v3 = vpop.permute.xlu1 %1060  ;;  %v1379_v1 = vsel %vm1372_vm7, %v1346_v42, %v869_v21  ;;  %v2263_v21 = vld [vmem:[%s2342_s17 + $0x60] sm:$0xff] }
 0x140   : > { %v967_v39 = vpop.permute.xlu0 %966  ;;  %v1412_v24 = vsel %vm1405_vm8, %v1379_v1, %v965_v7  ;;  %v418_v29 = vsel %vm365_vm1, %v416_v55, %v417_v61  ;;  %v1249_v31 = vsel %vm1240_vm3, %v2263_v21, %v2810_v59  ;;  %v2264_v7 = vld [vmem:[%s2342_s17 + $0x68] sm:$0xff]  ;;  %v3270_v21 = vld [vmem:[%s2342_s17 + $0x120] sm:$0xff] }
 0x141   : > { %604 = vrot.lane.b32.xlu1 %v413_v19, %s2301_s19  ;;  %v1445_v12 = vsel %vm1438_vm9, %v1412_v24, %v1061_v3  ;;  %v1413_v40 = vsel %vm1405_vm8, %v1380_v20, %v967_v39  ;;  %v1282_v60 = vsel %vm1273_vm4, %v1249_v31, %v2936_v33  ;;  %v420_v19 = vsel %vm365_vm1, %v417_v61, %v419_v22  ;;  %v4068_v24 = vld [vmem:[#allocation5_spill] sm:$0xff] }
 0x142   : > { %1174 = vrot.lane.b32.xlu0 %v415_v49, %s2307_s8  ;;  %v1315_v23 = vsel %vm1306_vm5, %v1282_v60, %v681_v50  ;;  %v1250_v3 = vsel %vm1240_vm3, %v2264_v7, %v2808_v17  ;;  %v4071_v7 = vld [vmem:[#allocation39_spill] sm:$0xff] }
 0x143   : > { %v777_v27 = vpop.permute.xlu1 %776 }
 0x144   : > { %v3144_v9 = vpop.permute.xlu0 %682  ;;  %v1348_v28 = vsel %vm1339_vm6, %v1315_v23, %v777_v27 }
 0x145   : > { %984 = vrot.lane.b32.xlu1 %v4061_v62, %s2305_s27 }
 0x146   : > { %890 = vrot.lane.b32.xlu0 %v415_v49, %s2304_s22 }
 0x147   : > { %v1157_v30 = vpop.permute.xlu1 %1156 }
 0x148   : > { %v1478_v53 = vsel %vm1471_vm10, %v1445_v12, %v1157_v30  ;;  %v1063_v41 = vpop.permute.xlu0 %1062  ;;  %v421_v12 = vrot.slane %v4066_v16, 2  ;;  %v422_v30 = vrot.slane %v4068_v24, 2 }
 0x149   : > { %700 = vrot.lane.b32.xlu1 %v4061_v62, %s2302_s20  ;;  %2196 = vmatprep.mubr.msk.f32.mxu0 %vm1509_vm11, %v1478_v53  ;;  %v1446_v2 = vsel %vm1438_vm9, %v1413_v40, %v1063_v41 }
 0x14a   : > { %606 = vrot.lane.b32.xlu0 %v415_v49, %s2301_s19  ;;  %v1283_v49 = vsel %vm1273_vm4, %v1250_v3, %v2934_v6  ;;  %v423_v5 = vsel %vm365_vm1, %v421_v12, %v422_v30  ;;  %v2272_v12 = vld [vmem:[%s2342_s17 + $0x98] sm:$0xff] }
 0x14b   : > { %v873_v54 = vpop.permute.xlu1 %872  ;;  %v1316_v46 = vsel %vm1306_vm5, %v1283_v49, %v3144_v9  ;;  %v4067_v9 = vld [vmem:[#allocation10_spill] sm:$0xff] }
 0x14c   : > { %v779_v63 = vpop.permute.xlu0 %778  ;;  %v1381_v59 = vsel %vm1372_vm7, %v1348_v28, %v873_v54  ;;  %v2265_v54 = vld [vmem:[%s2342_s17 + $0x78] sm:$0xff] }
 0x14d   : > { %1080 = vrot.lane.b32.xlu1 %v4062_v13, %s2306_s30  ;;  %v1349_v18 = vsel %vm1339_vm6, %v1316_v46, %v779_v63  ;;  %v1251_v26 = vsel %vm1240_vm3, %v2265_v54, %v2818_v51 }
 0x14e   : > { %986 = vrot.lane.b32.xlu0 %v4063_v36, %s2305_s27  ;;  %v1284_v63 = vsel %vm1273_vm4, %v1251_v26, %v2944_v52 }
 0x14f   : > { %v875_v45 = vpop.permute.xlu1 %874 }
 0x150   : > { %v1159_v4 = vpop.permute.xlu0 %1158  ;;  %v1382_v27 = vsel %vm1372_vm7, %v1349_v18, %v875_v45 }
 0x151   : > { %v1479_v15 = vsel %vm1471_vm10, %v1446_v2, %v1159_v4  ;;  %796 = vrot.lane.b32.xlu1 %v4062_v13, %s2303_s21 }
 0x152   : > { %702 = vrot.lane.b32.xlu0 %v4063_v36, %s2302_s20  ;;  %2197 = vmatmul.mubr.msk.f32.gmra.mxu0 %vm1509_vm11, %v1479_v15  ;;  %v2266_v36 = vld [vmem:[%s2342_s17 + $0x118] sm:$0x3] }
 0x153   : > { %v685_v44 = vpop.permute.xlu1 %684  ;;  %v424_v55 = vrot.slane %v2266_v36, 2 }
 0x154   : > { %v969_v10 = vpop.permute.xlu0 %968  ;;  %v1317_v13 = vsel %vm1306_vm5, %v1284_v63, %v685_v44  ;;  %v2267_v44 = vld [vmem:[%s2342_s17 + $0x80] sm:$0xff] }
 0x155   : > { %1176 = vrot.lane.b32.xlu1 %v418_v29, %s2307_s8  ;;  %v1414_v8 = vsel %vm1405_vm8, %v1381_v59, %v969_v10  ;;  %v425_v4 = vsel %vm365_vm1, %v422_v30, %v424_v55  ;;  %v1252_v10 = vsel %vm1240_vm3, %v2267_v44, %v2816_v25  ;;  %v3288_v59 = vld [vmem:[%s2342_s17 + $0x128] sm:$0xff] }
 0x156   : > { %1082 = vrot.lane.b32.xlu0 %v4064_v34, %s2306_s30  ;;  %v4073_v30 = vld [vmem:[#allocation19_spill] sm:$0xff] }
 0x157   : > { %v1065_v14 = vpop.permute.xlu1 %1064 }
 0x158   : > { %v971_v0 = vpop.permute.xlu0 %970  ;;  %v1447_v33 = vsel %vm1438_vm9, %v1414_v8, %v1065_v14  ;;  %v426_v8 = vrot.slane %v3270_v21, 2 }
 0x159   : > { %892 = vrot.lane.b32.xlu1 %v418_v29, %s2304_s22  ;;  %v1415_v17 = vsel %vm1405_vm8, %v1382_v27, %v971_v0 }
 0x15a   : > { %798 = vrot.lane.b32.xlu0 %v4064_v34, %s2303_s21  ;;  %v1285_v34 = vsel %vm1273_vm4, %v1252_v10, %v2942_v38 }
 0x15b   : > { %v781_v11 = vpop.permute.xlu1 %780 }
 0x15c   : > { %v3196_v58 = vpop.permute.xlu0 %686  ;;  %v1350_v61 = vsel %vm1339_vm6, %v1317_v13, %v781_v11 }
 0x15d   : > { %608 = vrot.lane.b32.xlu1 %v418_v29, %s2301_s19  ;;  %v1318_v35 = vsel %vm1306_vm5, %v1285_v34, %v3196_v58  ;;  %v4070_v58 = vld [vmem:[#allocation12_spill] sm:$0xff] }
 0x15e   : > { %1178 = vrot.lane.b32.xlu0 %v420_v19, %s2307_s8 }
 0x15f   : > { %v1161_v48 = vpop.permute.xlu1 %1160 }
 0x160   : > { %v1480_v56 = vsel %vm1471_vm10, %v1447_v33, %v1161_v48  ;;  %v1067_v50 = vpop.permute.xlu0 %1066  ;;  %v427_v33 = vrot.slane %v3288_v59, 2 }
 0x161   : > { %988 = vrot.lane.b32.xlu1 %v4066_v16, %s2305_s27  ;;  %2199 = vmatprep.mubr.msk.f32.mxu0 %vm1509_vm11, %v1480_v56  ;;  %v1448_v6 = vsel %vm1438_vm9, %v1415_v17, %v1067_v50  ;;  %v2270_v50 = vld [vmem:[%s2342_s17 + $0x90] sm:$0xff]  ;;  %v4072_v17 = vld [vmem:[#allocation11_spill] sm:$0xff] }
 0x162   : > { %894 = vrot.lane.b32.xlu0 %v420_v19, %s2304_s22  ;;  %v428_v49 = vsel %vm365_vm1, %v426_v8, %v427_v33  ;;  %v4078_v8 = vld [vmem:[#allocation13_spill] sm:$0xff] }
 0x163   : > { %v877_v39 = vpop.permute.xlu1 %876 }
 0x164   : > { %v783_v57 = vpop.permute.xlu0 %782  ;;  %v1383_v51 = vsel %vm1372_vm7, %v1350_v61, %v877_v39 }
 0x165   : > { %704 = vrot.lane.b32.xlu1 %v4066_v16, %s2302_s20  ;;  %v1351_v0 = vsel %vm1339_vm6, %v1318_v35, %v783_v57  ;;  %v1253_v16 = vsel %vm1240_vm3, %v2270_v50, %v2826_v37  ;;  %v4076_v35 = vld [vmem:[#allocation21_spill] sm:$0xff] }
 0x166   : > { %610 = vrot.lane.b32.xlu0 %v420_v19, %s2301_s19  ;;  %v1286_v3 = vsel %vm1273_vm4, %v1253_v16, %v4071_v7  ;;  %v2277_v7 = vld [vmem:[%s2342_s17 + $0xb0] sm:$0xff] }
 0x167   : > { %v879_v42 = vpop.permute.xlu1 %878 }
 0x168   : > { %v1163_v1 = vpop.permute.xlu0 %1162  ;;  %v1384_v25 = vsel %vm1372_vm7, %v1351_v0, %v879_v42  ;;  %v4077_v0 = vld [vmem:[#allocation41_spill] sm:$0xff] }
 0x169   : > { %v1481_v62 = vsel %vm1471_vm10, %v1448_v6, %v1163_v1  ;;  %1084 = vrot.lane.b32.xlu1 %v4067_v9, %s2306_s30  ;;  %v2271_v1 = vld [vmem:[%s2342_s17 + $0x130] sm:$0x3] }
 0x16a   : > { %990 = vrot.lane.b32.xlu0 %v4068_v24, %s2305_s27  ;;  %2200 = vmatmul.mubr.msk.f32.gmra.mxu0 %vm1509_vm11, %v1481_v62  ;;  %v429_v62 = vrot.slane %v2271_v1, 2 }
 0x16b   : > { %v3230_v53 = vpop.permute.xlu1 %688 }
 0x16c   : > { %v973_v41 = vpop.permute.xlu0 %972  ;;  %v1319_v39 = vsel %vm1306_vm5, %v1286_v3, %v3230_v53  ;;  %v1254_v53 = vsel %vm1240_vm3, %v2272_v12, %v4073_v30  ;;  %v4079_v3 = vld [vmem:[#allocation20_spill] sm:$0xff] }
 0x16d   : > { %800 = vrot.lane.b32.xlu1 %v4067_v9, %s2303_s21  ;;  %v1416_v45 = vsel %vm1405_vm8, %v1383_v51, %v973_v41  ;;  %v4074_v41 = vld [vmem:[#allocation38_spill] sm:$0xff]  ;;  %v3408_v12 = vld [vmem:[%s2342_s17 + $0x150] sm:$0xff] }
 0x16e   : > { %706 = vrot.lane.b32.xlu0 %v4068_v24, %s2302_s20 }
 0x16f   : > { %v1069_v43 = vpop.permute.xlu1 %1068 }
 0x170   : > { %v975_v47 = vpop.permute.xlu0 %974  ;;  %v1449_v52 = vsel %vm1438_vm9, %v1416_v45, %v1069_v43 }
 0x171   : > { %1180 = vrot.lane.b32.xlu1 %v423_v5, %s2307_s8  ;;  %v1417_v31 = vsel %vm1405_vm8, %v1384_v25, %v975_v47  ;;  %v430_v47 = vsel %vm365_vm1, %v427_v33, %v429_v62 }
 0x172   : > { %1086 = vrot.lane.b32.xlu0 %v4069_v32, %s2306_s30 }
 0x173   : > { %v785_v20 = vpop.permute.xlu1 %784 }
 0x174   : > { %v3248_v40 = vpop.permute.xlu0 %690  ;;  %v1352_v57 = vsel %vm1339_vm6, %v1319_v39, %v785_v20  ;;  %v4080_v39 = vld [vmem:[#allocation40_spill] sm:$0xff] }
 0x175   : > { %896 = vrot.lane.b32.xlu1 %v423_v5, %s2304_s22 }
 0x176   : > { %802 = vrot.lane.b32.xlu0 %v4069_v32, %s2303_s21 }
 0x177   : > { %v1165_v2 = vpop.permute.xlu1 %1164 }
 0x178   : > { %v1482_v15 = vsel %vm1471_vm10, %v1449_v52, %v1165_v2  ;;  %v1071_v29 = vpop.permute.xlu0 %1070 }
 0x179   : > { %612 = vrot.lane.b32.xlu1 %v423_v5, %s2301_s19  ;;  %2202 = vmatprep.mubr.msk.f32.mxu0 %vm1509_vm11, %v1482_v15  ;;  %v1450_v60 = vsel %vm1438_vm9, %v1417_v31, %v1071_v29  ;;  %v1287_v5 = vsel %vm1273_vm4, %v1254_v53, %v4074_v41  ;;  %v3355_v15 = vld [vmem:[%s2342_s17 + $0x140] sm:$0xff] }
 0x17a   : > { %1182 = vrot.lane.b32.xlu0 %v425_v4, %s2307_s8  ;;  %v1320_v54 = vsel %vm1306_vm5, %v1287_v5, %v3248_v40  ;;  %v3339_v40 = vld [vmem:[%s2342_s17 + $0x138] sm:$0xff]  ;;  %v432_v44 = vrot.slane %v3355_v15, 2 }
 0x17b   : > { %v881_v14 = vpop.permute.xlu1 %880  ;;  %v431_v29 = vrot.slane %v3339_v40, 2 }
 0x17c   : > { %v787_v22 = vpop.permute.xlu0 %786  ;;  %v1385_v37 = vsel %vm1372_vm7, %v1352_v57, %v881_v14  ;;  %v2275_v14 = vld [vmem:[%s2342_s17 + $0xa8] sm:$0xff] }
 0x17d   : > { %992 = vrot.lane.b32.xlu1 %v3270_v21, %s2305_s27  ;;  %v1353_v63 = vsel %vm1339_vm6, %v1320_v54, %v787_v22  ;;  %v1255_v22 = vsel %vm1240_vm3, %v2275_v14, %v4076_v35  ;;  %v433_v31 = vsel %vm365_vm1, %v431_v29, %v432_v44  ;;  %v436_v54 = vrot.slane %v3408_v12, 2  ;;  %v2281_v35 = vld [vmem:[%s2342_s17 + $0x160] sm:$0x3] }
 0x17e   : > { %898 = vrot.lane.b32.xlu0 %v425_v4, %s2304_s22  ;;  %v1288_v25 = vsel %vm1273_vm4, %v1255_v22, %v4077_v0  ;;  %v439_v22 = vrot.slane %v2281_v35, 2 }
 0x17f   : > { %v883_v38 = vpop.permute.xlu1 %882 }
 0x180   : > { %v1167_v23 = vpop.permute.xlu0 %1166  ;;  %v1386_v32 = vsel %vm1372_vm7, %v1353_v63, %v883_v38 }
 0x181   : > { %v1483_v11 = vsel %vm1471_vm10, %v1450_v60, %v1167_v23  ;;  %708 = vrot.lane.b32.xlu1 %v3270_v21, %s2302_s20 }
 0x182   : > { %614 = vrot.lane.b32.xlu0 %v425_v4, %s2301_s19  ;;  %2203 = vmatmul.mubr.msk.f32.gmra.mxu0 %vm1509_vm11, %v1483_v11  ;;  %v4075_v4 = vld [vmem:[#allocation14_spill] sm:$0xff] }
 0x183   : > { %v3283_v19 = vpop.permute.xlu1 %692 }
 0x184   : > { %v977_v28 = vpop.permute.xlu0 %976  ;;  %v1321_v38 = vsel %vm1306_vm5, %v1288_v25, %v3283_v19 }
 0x185   : > { %1088 = vrot.lane.b32.xlu1 %v4070_v58, %s2306_s30  ;;  %v1418_v27 = vsel %vm1405_vm8, %v1385_v37, %v977_v28 }
 0x186   : > { %994 = vrot.lane.b32.xlu0 %v3288_v59, %s2305_s27 }
 0x187   : > { %v1073_v48 = vpop.permute.xlu1 %1072 }
 0x188   : > { %v979_v56 = vpop.permute.xlu0 %978  ;;  %v1451_v42 = vsel %vm1438_vm9, %v1418_v27, %v1073_v48 }
 0x189   : > { %804 = vrot.lane.b32.xlu1 %v4070_v58, %s2303_s21  ;;  %v1419_v13 = vsel %vm1405_vm8, %v1386_v32, %v979_v56  ;;  %v2276_v56 = vld [vmem:[%s2342_s17 + $0x148] sm:$0x3] }
 0x18a   : > { %710 = vrot.lane.b32.xlu0 %v3288_v59, %s2302_s20  ;;  %v434_v19 = vrot.slane %v2276_v56, 2 }
 0x18b   : > { %v789_v46 = vpop.permute.xlu1 %788 }
 0x18c   : > { %v3307_v18 = vpop.permute.xlu0 %694  ;;  %v1354_v23 = vsel %vm1339_vm6, %v1321_v38, %v789_v46  ;;  %v435_v37 = vsel %vm365_vm1, %v432_v44, %v434_v19  ;;  %v4084_v38 = vld [vmem:[#allocation22_spill] sm:$0xff] }
 0x18d   : > { %1184 = vrot.lane.b32.xlu1 %v428_v49, %s2307_s8 }
 0x18e   : > { %1090 = vrot.lane.b32.xlu0 %v4072_v17, %s2306_s30 }
 0x18f   : > { %v1169_v6 = vpop.permute.xlu1 %1168 }
 0x190   : > { %v1484_v9 = vsel %vm1471_vm10, %v1451_v42, %v1169_v6  ;;  %v1075_v24 = vpop.permute.xlu0 %1074 }
 0x191   : > { %900 = vrot.lane.b32.xlu1 %v428_v49, %s2304_s22  ;;  %2205 = vmatprep.mubr.msk.f32.mxu0 %vm1509_vm11, %v1484_v9  ;;  %v1452_v36 = vsel %vm1438_vm9, %v1419_v13, %v1075_v24  ;;  %v2280_v13 = vld [vmem:[%s2342_s17 + $0xc0] sm:$0xff] }
 0x192   : > { %806 = vrot.lane.b32.xlu0 %v4072_v17, %s2303_s21 }
 0x193   : > { %v885_v43 = vpop.permute.xlu1 %884 }
 0x194   : > { %v791_v26 = vpop.permute.xlu0 %790  ;;  %v1387_v28 = vsel %vm1372_vm7, %v1354_v23, %v885_v43  ;;  %v4081_v43 = vld [vmem:[#allocation16_spill] sm:$0xff] }
 0x195   : > { %616 = vrot.lane.b32.xlu1 %v428_v49, %s2301_s19  ;;  %v1256_v49 = vsel %vm1240_vm3, %v2277_v7, %v4079_v3 }
 0x196   : > { %1186 = vrot.lane.b32.xlu0 %v430_v47, %s2307_s8  ;;  %v1289_v46 = vsel %vm1273_vm4, %v1256_v49, %v4080_v39  ;;  %v3494_v49 = vld [vmem:[%s2342_s17 + $0x168] sm:$0xff] }
 0x197   : > { %v3334_v20 = vpop.permute.xlu1 %600  ;;  %v1322_v27 = vsel %vm1306_vm5, %v1289_v46, %v3307_v18 }
 0x198   : > { %v1171_v55 = vpop.permute.xlu0 %1170  ;;  %v1355_v42 = vsel %vm1339_vm6, %v1322_v27, %v791_v26  ;;  %v4085_v27 = vld [vmem:[#allocation18_spill] sm:$0xff] }
 0x199   : > { %v1485_v61 = vsel %vm1471_vm10, %v1452_v36, %v1171_v55  ;;  %996 = vrot.lane.b32.xlu1 %v3339_v40, %s2305_s27  ;;  %v4082_v36 = vld [vmem:[#allocation23_spill] sm:$0xff] }
 0x19a   : > { %902 = vrot.lane.b32.xlu0 %v430_v47, %s2304_s22  ;;  %2206 = vmatmul.mubr.msk.f32.gmra.mxu0 %vm1509_vm11, %v1485_v61  ;;  %v1257_v55 = vsel %vm1240_vm3, %v2280_v13, %v4082_v36 }
 0x19b   : > { %v981_v51 = vpop.permute.xlu1 %980  ;;  %v1290_v61 = vsel %vm1273_vm4, %v1257_v55, %v3334_v20  ;;  %v4087_v55 = vld [vmem:[#allocation17_spill] sm:$0xff] }
 0x19c   : > { %v887_v45 = vpop.permute.xlu0 %886  ;;  %v1420_v58 = vsel %vm1405_vm8, %v1387_v28, %v981_v51 }
 0x19d   : > { %712 = vrot.lane.b32.xlu1 %v3339_v40, %s2302_s20  ;;  %v1388_v6 = vsel %vm1372_vm7, %v1355_v42, %v887_v45  ;;  %v441_v42 = vrot.slane %v3494_v49, 2 }
 0x19e   : > { %618 = vrot.lane.b32.xlu0 %v430_v47, %s2301_s19  ;;  %v3424_v47 = vld [vmem:[%s2342_s17 + $0x158] sm:$0xff] }
 0x19f   : > { %v3348_v52 = vpop.permute.xlu1 %696  ;;  %v437_v26 = vrot.slane %v3424_v47, 2 }
 0x1a0   : > { %v3350_v2 = vpop.permute.xlu0 %602  ;;  %v1323_v45 = vsel %vm1306_vm5, %v1290_v61, %v3348_v52 }
 0x1a1   : > { %1092 = vrot.lane.b32.xlu1 %v4075_v4, %s2306_s30  ;;  %v438_v51 = vsel %vm365_vm1, %v436_v54, %v437_v26 }
 0x1a2   : > { %998 = vrot.lane.b32.xlu0 %v3355_v15, %s2305_s27 }
 0x1a3   : > { %v1077_v10 = vpop.permute.xlu1 %1076 }
 0x1a4   : > { %v983_v34 = vpop.permute.xlu0 %982  ;;  %v1453_v33 = vsel %vm1438_vm9, %v1420_v58, %v1077_v10 }
 0x1a5   : > { %808 = vrot.lane.b32.xlu1 %v4075_v4, %s2303_s21  ;;  %v1421_v1 = vsel %vm1405_vm8, %v1388_v6, %v983_v34  ;;  %v4083_v34 = vld [vmem:[#allocation15_spill] sm:$0xff] }
 0x1a6   : > { %714 = vrot.lane.b32.xlu0 %v3355_v15, %s2302_s20 }
 0x1a7   : > { %v793_v60 = vpop.permute.xlu1 %792 }
 0x1a8   : > { %v3374_v11 = vpop.permute.xlu0 %698  ;;  %v1356_v29 = vsel %vm1339_vm6, %v1323_v45, %v793_v60 }
 0x1a9   : > { %1188 = vrot.lane.b32.xlu1 %v433_v31, %s2307_s8 }
 0x1aa   : > { %1094 = vrot.lane.b32.xlu0 %v4078_v8, %s2306_s30 }
 0x1ab   : > { %v1173_v48 = vpop.permute.xlu1 %1172 }
 0x1ac   : > { %v1486_v50 = vsel %vm1471_vm10, %v1453_v33, %v1173_v48  ;;  %v1079_v16 = vpop.permute.xlu0 %1078 }
 0x1ad   : > { %904 = vrot.lane.b32.xlu1 %v433_v31, %s2304_s22  ;;  %2208 = vmatprep.mubr.msk.f32.mxu0 %vm1509_vm11, %v1486_v50  ;;  %v1454_v9 = vsel %vm1438_vm9, %v1421_v1, %v1079_v16 }
 0x1ae   : > { %810 = vrot.lane.b32.xlu0 %v4078_v8, %s2303_s21  ;;  %v440_v8 = vsel %vm365_vm1, %v437_v26, %v439_v22 }
 0x1af   : > { %v889_v57 = vpop.permute.xlu1 %888 }
 0x1b0   : > { %v3396_v17 = vpop.permute.xlu0 %794  ;;  %v1389_v10 = vsel %vm1372_vm7, %v1356_v29, %v889_v57 }
 0x1b1   : > { %620 = vrot.lane.b32.xlu1 %v433_v31, %s2301_s19  ;;  %v2282_v31 = vld [vmem:[%s2342_s17 + $0xc8] sm:$0xff] }
 0x1b2   : > { %1190 = vrot.lane.b32.xlu0 %v435_v37, %s2307_s8  ;;  %v1258_v60 = vsel %vm1240_vm3, %v2282_v31, %v4084_v38 }
 0x1b3   : > { %v3403_v62 = vpop.permute.xlu1 %604  ;;  %v1291_v28 = vsel %vm1273_vm4, %v1258_v60, %v3350_v2  ;;  %v230_v60 = vld [vmem:[%s2342_s17 + $0x180] sm:$0xff] }
 0x1b4   : > { %v1175_v24 = vpop.permute.xlu0 %1174  ;;  %v1324_v33 = vsel %vm1306_vm5, %v1291_v28, %v3374_v11 }
 0x1b5   : > { %v1487_v18 = vsel %vm1471_vm10, %v1454_v9, %v1175_v24  ;;  %1000 = vrot.lane.b32.xlu1 %v3408_v12, %s2305_s27  ;;  %v1357_v19 = vsel %vm1339_vm6, %v1324_v33, %v3396_v17  ;;  %v3510_v17 = vld [vmem:[%s2342_s17 + $0x170] sm:$0xff]  ;;  %v2285_v24 = vld [vmem:[%s2342_s17 + $0xd8] sm:$0xff] }
 0x1b6   : > { %906 = vrot.lane.b32.xlu0 %v435_v37, %s2304_s22  ;;  %2209 = vmatmul.mubr.msk.f32.gmra.mxu0 %vm1509_vm11, %v1487_v18  ;;  %v442_v6 = vrot.slane %v3510_v17, 2  ;;  %v4086_v18 = vld [vmem:[#allocation25_spill] sm:$0xff] }
 0x1b7   : > { %v985_v30 = vpop.permute.xlu1 %984 }
 0x1b8   : > { %v891_v53 = vpop.permute.xlu0 %890  ;;  %v1422_v20 = vsel %vm1405_vm8, %v1389_v10, %v985_v30  ;;  %v1259_v30 = vsel %vm1240_vm3, %v2285_v24, %v4086_v18  ;;  %v4089_v24 = vld [vmem:[#allocation27_spill] sm:$0xff] }
 0x1b9   : > { %716 = vrot.lane.b32.xlu1 %v3408_v12, %s2302_s20  ;;  %v1390_v2 = vsel %vm1372_vm7, %v1357_v19, %v891_v53  ;;  %v1292_v53 = vsel %vm1273_vm4, %v1259_v30, %v3403_v62 }
 0x1ba   : > { %622 = vrot.lane.b32.xlu0 %v435_v37, %s2301_s19 }
 0x1bb   : > { %v3417_v41 = vpop.permute.xlu1 %700 }
 0x1bc   : > { %v3419_v5 = vpop.permute.xlu0 %606  ;;  %v1325_v54 = vsel %vm1306_vm5, %v1292_v53, %v3417_v41 }
 0x1bd   : > { %1096 = vrot.lane.b32.xlu1 %v4081_v43, %s2306_s30 }
 0x1be   : > { %1002 = vrot.lane.b32.xlu0 %v3424_v47, %s2305_s27 }
 0x1bf   : > { %v1081_v63 = vpop.permute.xlu1 %1080 }
 0x1c0   : > { %v987_v32 = vpop.permute.xlu0 %986  ;;  %v1455_v14 = vsel %vm1438_vm9, %v1422_v20, %v1081_v63  ;;  %v2287_v20 = vld [vmem:[%s2342_s17 + $0xe0] sm:$0xff] }
 0x1c1   : > { %812 = vrot.lane.b32.xlu1 %v4081_v43, %s2303_s21  ;;  %v1423_v50 = vsel %vm1405_vm8, %v1390_v2, %v987_v32  ;;  %v443_v43 = vsel %vm365_vm1, %v441_v42, %v442_v6 }
 0x1c2   : > { %718 = vrot.lane.b32.xlu0 %v3424_v47, %s2302_s20 }
 0x1c3   : > { %v3442_v4 = vpop.permute.xlu1 %796 }
 0x1c4   : > { %v3445_v44 = vpop.permute.xlu0 %702  ;;  %v1358_v63 = vsel %vm1339_vm6, %v1325_v54, %v3442_v4 }
 0x1c5   : > { %1192 = vrot.lane.b32.xlu1 %v438_v51, %s2307_s8 }
 0x1c6   : > { %1098 = vrot.lane.b32.xlu0 %v4083_v34, %s2306_s30 }
 0x1c7   : > { %v1177_v52 = vpop.permute.xlu1 %1176 }
 0x1c8   : > { %v1083_v0 = vpop.permute.xlu0 %1082  ;;  %v1488_v25 = vsel %vm1471_vm10, %v1455_v14, %v1177_v52 }
 0x1c9   : > { %908 = vrot.lane.b32.xlu1 %v438_v51, %s2304_s22  ;;  %2211 = vmatprep.mubr.msk.f32.mxu1 %vm1509_vm11, %v1488_v25  ;;  %v1456_v11 = vsel %vm1438_vm9, %v1423_v50, %v1083_v0 }
 0x1ca   : > { %v3466_v23 = vpop.f32.mrf.mxu0  ;;  %814 = vrot.lane.b32.xlu0 %v4083_v34, %s2303_s21  ;;  %v4088_v34 = vld [vmem:[#allocation24_spill] sm:$0xff] }
 0x1cb   : > { %1978 = vst [vmem:[%s3458_s14 + $0x8] sm:$0xff] %v3466_v23  ;;  %v893_v58 = vpop.permute.xlu1 %892  ;;  %v1260_v14 = vsel %vm1240_vm3, %v2287_v20, %v4088_v34  ;;  %v4090_v20 = vld [vmem:[#allocation26_spill] sm:$0xff] }
 0x1cc   : > { %v3477_v48 = vpop.f32.mrf.mxu0  ;;  %v3479_v56 = vpop.permute.xlu0 %798  ;;  %v1391_v13 = vsel %vm1372_vm7, %v1358_v63, %v893_v58  ;;  %v1293_v52 = vsel %vm1273_vm4, %v1260_v14, %v3419_v5  ;;  %v231_v58 = vld [vmem:[%s2342_s17 + $0x188] sm:$0xff] }
 0x1cd   : > { %1977 = vst [vmem:[%s3458_s14] sm:$0xff] %v3477_v48  ;;  %624 = vrot.lane.b32.xlu1 %v438_v51, %s2301_s19  ;;  %v2286_v51 = vld [vmem:[%s2342_s17 + $0x178] sm:$0x3]  ;;  %v1326_v0 = vsel %vm1306_vm5, %v1293_v52, %v3445_v44  ;;  %v450_v19 = vrot.slane %v231_v58, 1 }
 0x1ce   : > { %1194 = vrot.lane.b32.xlu0 %v440_v8, %s2307_s8  ;;  %v444_v45 = vrot.slane %v2286_v51, 2  ;;  %v1359_v31 = vsel %vm1339_vm6, %v1326_v0, %v3479_v56  ;;  %v449_v56 = vrot.slane %v230_v60, 1  ;;  %v235_v0 = vld [vmem:[%s2342_s17 + $0x1a8] sm:$0x3] }
 0x1cf   : > { %v3489_v16 = vpop.permute.xlu1 %608 }
 0x1d0   : > { %v1179_v7 = vpop.permute.xlu0 %1178  ;;  %v445_v22 = vsel %vm365_vm1, %v442_v6, %v444_v45 }
 0x1d1   : > { %v1489_v3 = vsel %vm1471_vm10, %v1456_v11, %v1179_v7  ;;  %1004 = vrot.lane.b32.xlu1 %v3494_v49, %s2305_s27  ;;  %v451_v11 = vsel %vm284_vm0, %v449_v56, %v450_v19 }
 0x1d2   : > { %910 = vrot.lane.b32.xlu0 %v440_v8, %s2304_s22  ;;  %2212 = vmatmul.mubr.msk.f32.vlgmr.msra.gmra.mxu1 %vm1509_vm11, %v1489_v3 }
 0x1d3   : > { %v989_v39 = vpop.permute.xlu1 %988 }
 0x1d4   : > { %v895_v46 = vpop.permute.xlu0 %894  ;;  %v1424_v62 = vsel %vm1405_vm8, %v1391_v13, %v989_v39  ;;  %v232_v39 = vld [vmem:[%s2342_s17 + $0x190] sm:$0x3] }
 0x1d5   : > { %720 = vrot.lane.b32.xlu1 %v3494_v49, %s2302_s20  ;;  %v1392_v38 = vsel %vm1372_vm7, %v1359_v31, %v895_v46  ;;  %v454_v46 = vrot.slane %v230_v60, 2  ;;  %v452_v6 = vrot.slane %v232_v39, 1 }
 0x1d6   : > { %626 = vrot.lane.b32.xlu0 %v440_v8, %s2301_s19 }
 0x1d7   : > { %v3503_v57 = vpop.permute.xlu1 %704  ;;  %v453_v13 = vsel %vm284_vm0, %v450_v19, %v452_v6 }
 0x1d8   : > { %v3505_v37 = vpop.permute.xlu0 %610 }
 0x1d9   : > { %1100 = vrot.lane.b32.xlu1 %v4085_v27, %s2306_s30 }
 0x1da   : > { %1006 = vrot.lane.b32.xlu0 %v3510_v17, %s2305_s27 }
 0x1db   : > { %v1085_v1 = vpop.permute.xlu1 %1084 }
 0x1dc   : > { %v991_v9 = vpop.permute.xlu0 %990  ;;  %v1457_v41 = vsel %vm1438_vm9, %v1424_v62, %v1085_v1 }
 0x1dd   : > { %816 = vrot.lane.b32.xlu1 %v4085_v27, %s2303_s21  ;;  %v1425_v5 = vsel %vm1405_vm8, %v1392_v38, %v991_v9  ;;  %v455_v27 = vrot.slane %v231_v58, 2  ;;  %v2288_v9 = vld [vmem:[%s2342_s17 + $0xf0] sm:$0xff] }
 0x1de   : > { %722 = vrot.lane.b32.xlu0 %v3510_v17, %s2302_s20  ;;  %v1261_v18 = vsel %vm1240_vm3, %v2288_v9, %v4089_v24 }
 0x1df   : > { %v3528_v26 = vpop.permute.xlu1 %800  ;;  %v1294_v30 = vsel %vm1273_vm4, %v1261_v18, %v3489_v16 }
 0x1e0   : > { %v3532_v32 = vpop.permute.xlu0 %706  ;;  %v1327_v54 = vsel %vm1306_vm5, %v1294_v30, %v3503_v57 }
 0x1e1   : > { %1196 = vrot.lane.b32.xlu1 %v443_v43, %s2307_s8  ;;  %v1360_v62 = vsel %vm1339_vm6, %v1327_v54, %v3528_v26 }
 0x1e2   : > { %v3537_v36 = vpop.f32.mrf.mxu0  ;;  %1102 = vrot.lane.b32.xlu0 %v4087_v55, %s2306_s30 }
 0x1e3   : > { %1980 = vst [vmem:[%s3458_s14 + $0x18] sm:$0xff] %v3537_v36  ;;  %v1181_v61 = vpop.permute.xlu1 %1180 }
 0x1e4   : > { %v1490_v4 = vsel %vm1471_vm10, %v1457_v41, %v1181_v61  ;;  %v3546_v29 = vpop.f32.mrf.mxu0  ;;  %v1087_v10 = vpop.permute.xlu0 %1086  ;;  %v457_v61 = vrot.slane %v232_v39, 2 }
 0x1e5   : > { %1979 = vst [vmem:[%s3458_s14 + $0x10] sm:$0xff] %v3546_v29  ;;  %912 = vrot.lane.b32.xlu1 %v443_v43, %s2304_s22  ;;  %2214 = vmatprep.mubr.msk.f32.mxu1 %vm1509_vm11, %v1490_v4  ;;  %v1458_v44 = vsel %vm1438_vm9, %v1425_v5, %v1087_v10  ;;  %v2289_v10 = vld [vmem:[%s2342_s17 + $0xf8] sm:$0xff] }
 0x1e6   : > { %818 = vrot.lane.b32.xlu0 %v4087_v55, %s2303_s21  ;;  %v1262_v34 = vsel %vm1240_vm3, %v2289_v10, %v4090_v20  ;;  %v458_v14 = vsel %vm365_vm1, %v455_v27, %v457_v61 }
 0x1e7   : > { %v897_v35 = vpop.permute.xlu1 %896  ;;  %v1295_v52 = vsel %vm1273_vm4, %v1262_v34, %v3505_v37 }
 0x1e8   : > { %v3562_v25 = vpop.permute.xlu0 %802  ;;  %v1393_v41 = vsel %vm1372_vm7, %v1360_v62, %v897_v35  ;;  %v1328_v31 = vsel %vm1306_vm5, %v1295_v52, %v3532_v32  ;;  %v4091_v62 = vld [vmem:[#allocation29_spill] sm:$0xff] }
 0x1e9   : > { %628 = vrot.lane.b32.xlu1 %v443_v43, %s2301_s19  ;;  %v456_v43 = vsel %vm365_vm1, %v454_v46, %v455_v27  ;;  %v1361_v5 = vsel %vm1339_vm6, %v1328_v31, %v3562_v25 }
 0x1ea   : > { %1198 = vrot.lane.b32.xlu0 %v445_v22, %s2307_s8 }
 0x1eb   : > { %v3571_v28 = vpop.permute.xlu1 %612 }
 0x1ec   : > { %v1183_v8 = vpop.permute.xlu0 %1182 }
 0x1ed   : > { %v1491_v33 = vsel %vm1471_vm10, %v1458_v44, %v1183_v8  ;;  %1008 = vrot.lane.b32.xlu1 %v230_v60, %s2305_s27  ;;  %v465_v8 = vrot.slane %v235_v0, 1 }
 0x1ee   : > { %914 = vrot.lane.b32.xlu0 %v445_v22, %s2304_s22  ;;  %2215 = vmatmul.mubr.msk.f32.gmra.mxu1 %vm1509_vm11, %v1491_v33 }
 0x1ef   : > { %v993_v2 = vpop.permute.xlu1 %992 }
 0x1f0   : > { %v899_v50 = vpop.permute.xlu0 %898  ;;  %v1426_v57 = vsel %vm1405_vm8, %v1393_v41, %v993_v2 }
 0x1f1   : > { %724 = vrot.lane.b32.xlu1 %v230_v60, %s2302_s20  ;;  %v233_v60 = vld [vmem:[%s2342_s17 + $0x198] sm:$0xff] }
 0x1f2   : > { %630 = vrot.lane.b32.xlu0 %v445_v22, %s2301_s19  ;;  %v234_v22 = vld [vmem:[%s2342_s17 + $0x1a0] sm:$0xff]  ;;  %v462_v56 = vrot.slane %v233_v60, 1  ;;  %v467_v39 = vrot.slane %v233_v60, 2 }
 0x1f3   : > { %v3582_v7 = vpop.permute.xlu1 %708  ;;  %v463_v44 = vrot.slane %v234_v22, 1  ;;  %v468_v25 = vrot.slane %v234_v22, 2 }
 0x1f4   : > { %v3584_v3 = vpop.permute.xlu0 %614 }
 0x1f5   : > { %1104 = vrot.lane.b32.xlu1 %v451_v11, %s2306_s30  ;;  %v464_v27 = vsel %vm284_vm0, %v462_v56, %v463_v44  ;;  %v469_v9 = vsel %vm365_vm1, %v467_v39, %v468_v25 }
 0x1f6   : > { %1010 = vrot.lane.b32.xlu0 %v231_v58, %s2305_s27 }
 0x1f7   : > { %v1089_v42 = vpop.permute.xlu1 %1088 }
 0x1f8   : > { %v995_v1 = vpop.permute.xlu0 %994  ;;  %v1459_v51 = vsel %vm1438_vm9, %v1426_v57, %v1089_v42 }
 0x1f9   : > { %820 = vrot.lane.b32.xlu1 %v451_v11, %s2303_s21  ;;  %v470_v11 = vrot.slane %v235_v0, 2 }
 0x1fa   : > { %v3595_v53 = vpop.f32.mrf.mxu0  ;;  %726 = vrot.lane.b32.xlu0 %v231_v58, %s2302_s20  ;;  %v1394_v58 = vsel %vm1372_vm7, %v1361_v5, %v899_v50  ;;  %v466_v50 = vsel %vm284_vm0, %v463_v44, %v465_v8 }
 0x1fb   : > { %1982 = vst [vmem:[%s3458_s14 + $0x28] sm:$0xff] %v3595_v53  ;;  %v3603_v63 = vpop.permute.xlu1 %804  ;;  %v1427_v37 = vsel %vm1405_vm8, %v1394_v58, %v995_v1  ;;  %v471_v6 = vsel %vm365_vm1, %v468_v25, %v470_v11  ;;  %v4093_v11 = vld [vmem:[#allocation31_spill] sm:$0xff] }
 0x1fc   : > { %v3608_v16 = vpop.f32.mrf.mxu0  ;;  %v3610_v55 = vpop.permute.xlu0 %710  ;;  %v1265_v39 = vsel %vm1240_vm3, %v3270_v21, %v4093_v11  ;;  %v4094_v21 = vld [vmem:[#allocation30_spill] sm:$0xff] }
 0x1fd   : > { %1981 = vst [vmem:[%s3458_s14 + $0x20] sm:$0xff] %v3608_v16  ;;  %1200 = vrot.lane.b32.xlu1 %v456_v43, %s2307_s8 }
 0x1fe   : > { %1106 = vrot.lane.b32.xlu0 %v453_v13, %s2306_s30 }
 0x1ff   : > { %v1185_v26 = vpop.permute.xlu1 %1184 }
 0x200   : > { %v1492_v45 = vsel %vm1471_vm10, %v1459_v51, %v1185_v26  ;;  %v1091_v4 = vpop.permute.xlu0 %1090 }
 0x201   : > { %916 = vrot.lane.b32.xlu1 %v456_v43, %s2304_s22  ;;  %2217 = vmatprep.mubr.msk.f32.mxu1 %vm1509_vm11, %v1492_v45  ;;  %v1460_v32 = vsel %vm1438_vm9, %v1427_v37, %v1091_v4 }
 0x202   : > { %822 = vrot.lane.b32.xlu0 %v453_v13, %s2303_s21  ;;  %v2290_v13 = vld [vmem:[%s2342_s17 + $0x108] sm:$0xff] }
 0x203   : > { %v901_v35 = vpop.permute.xlu1 %900  ;;  %v1263_v41 = vsel %vm1240_vm3, %v2290_v13, %v4091_v62 }
 0x204   : > { %v807_v38 = vpop.permute.xlu0 %806  ;;  %v1296_v57 = vsel %vm1273_vm4, %v1263_v41, %v3571_v28  ;;  %v2291_v28 = vld [vmem:[%s2342_s17 + $0x110] sm:$0xff] }
 0x205   : > { %918 = vrot.lane.b32.xlu1 %v458_v14, %s2304_s22  ;;  %v1329_v61 = vsel %vm1306_vm5, %v1296_v57, %v3582_v7 }
 0x206   : > { %1202 = vrot.lane.b32.xlu0 %v458_v14, %s2307_s8  ;;  %v1362_v26 = vsel %vm1339_vm6, %v1329_v61, %v3603_v63 }
 0x207   : > { %v3640_v33 = vpop.permute.xlu1 %616  ;;  %v1395_v4 = vsel %vm1372_vm7, %v1362_v26, %v901_v35 }
 0x208   : > { %v1187_v19 = vpop.permute.xlu0 %1186 }
 0x209   : > { %v1493_v2 = vsel %vm1471_vm10, %v1460_v32, %v1187_v19  ;;  %1014 = vrot.lane.b32.xlu1 %v234_v22, %s2305_s27  ;;  %v4092_v22 = vld [vmem:[#allocation28_spill] sm:$0xff] }
 0x20a   : > { %1012 = vrot.lane.b32.xlu0 %v233_v60, %s2305_s27  ;;  %2218 = vmatmul.mubr.msk.f32.gmra.mxu1 %vm1509_vm11, %v1493_v2  ;;  %v1264_v7 = vsel %vm1240_vm3, %v2291_v28, %v4092_v22 }
 0x20b   : > { %v997_v46 = vpop.permute.xlu1 %996  ;;  %v1297_v63 = vsel %vm1273_vm4, %v1264_v7, %v3584_v3 }
 0x20c   : > { %v903_v42 = vpop.permute.xlu0 %902  ;;  %v1428_v10 = vsel %vm1405_vm8, %v1395_v4, %v997_v46  ;;  %v1330_v35 = vsel %vm1306_vm5, %v1297_v63, %v3610_v55  ;;  %v1298_v46 = vsel %vm1273_vm4, %v1265_v39, %v3640_v33  ;;  %v1266_v33 = vsel %vm1240_vm3, %v3288_v59, %v4094_v21 }
 0x20d   : > { %1110 = vrot.lane.b32.xlu1 %v466_v50, %s2306_s30  ;;  %v1363_v60 = vsel %vm1339_vm6, %v1330_v35, %v807_v38 }
 0x20e   : > { %1108 = vrot.lane.b32.xlu0 %v464_v27, %s2306_s30  ;;  %v1396_v5 = vsel %vm1372_vm7, %v1363_v60, %v903_v42 }
 0x20f   : > { %v713_v1 = vpop.permute.xlu1 %712 }
 0x210   : > { %v619_v24 = vpop.permute.xlu0 %618  ;;  %v1331_v27 = vsel %vm1306_vm5, %v1298_v46, %v713_v1 }
 0x211   : > { %1206 = vrot.lane.b32.xlu1 %v471_v6, %s2307_s8  ;;  %v1299_v1 = vsel %vm1273_vm4, %v1266_v33, %v619_v24 }
 0x212   : > { %v3654_v18 = vpop.f32.mrf.mxu0  ;;  %1204 = vrot.lane.b32.xlu0 %v469_v9, %s2307_s8 }
 0x213   : > { %1984 = vst [vmem:[%s3458_s14 + $0x38] sm:$0xff] %v3654_v18  ;;  %v1093_v30 = vpop.permute.xlu1 %1092 }
 0x214   : > { %v3659_v43 = vpop.f32.mrf.mxu0  ;;  %v999_v54 = vpop.permute.xlu0 %998  ;;  %v1461_v20 = vsel %vm1438_vm9, %v1428_v10, %v1093_v30 }
 0x215   : > { %1983 = vst [vmem:[%s3458_s14 + $0x30] sm:$0xff] %v3659_v43  ;;  %v1429_v58 = vsel %vm1405_vm8, %v1396_v5, %v999_v54 }
 0x217   : > { %v809_v51 = vpop.permute.xlu1 %808 }
 0x218   : > { %v715_v45 = vpop.permute.xlu0 %714  ;;  %v1364_v6 = vsel %vm1339_vm6, %v1331_v27, %v809_v51 }
 0x219   : > { %v1332_v51 = vsel %vm1306_vm5, %v1299_v1, %v715_v45 }
 0x21b   : > { %v1189_v34 = vpop.permute.xlu1 %1188 }
 0x21c   : > { %v1494_v14 = vsel %vm1471_vm10, %v1461_v20, %v1189_v34  ;;  %v1095_v52 = vpop.permute.xlu0 %1094 }
 0x21d   : > { %2220 = vmatprep.mubr.msk.f32.mxu1 %vm1509_vm11, %v1494_v14  ;;  %v1462_v8 = vsel %vm1438_vm9, %v1429_v58, %v1095_v52 }
 0x21f   : > { %v905_v0 = vpop.permute.xlu1 %904 }
 0x220   : > { %v811_v31 = vpop.permute.xlu0 %810  ;;  %v1397_v30 = vsel %vm1372_vm7, %v1364_v6, %v905_v0 }
 0x221   : > { %v1365_v4 = vsel %vm1339_vm6, %v1332_v51, %v811_v31  ;;  %v4095_v31 = vld [vmem:[#allocation33_spill] sm:$0xff] }
 0x222   : > { %v1267_v60 = vsel %vm1240_vm3, %v3339_v40, %v4095_v31  ;;  %v4096_v40 = vld [vmem:[#allocation32_spill] sm:$0xff] }
 0x223   : > { %v621_v44 = vpop.permute.xlu1 %620 }
 0x224   : > { %v1191_v37 = vpop.permute.xlu0 %1190  ;;  %v1300_v5 = vsel %vm1273_vm4, %v1267_v60, %v621_v44  ;;  %v1268_v44 = vsel %vm1240_vm3, %v3355_v15, %v4096_v40 }
 0x225   : > { %v1495_v56 = vsel %vm1471_vm10, %v1462_v8, %v1191_v37 }
 0x226   : > { %2221 = vmatmul.mubr.msk.f32.gmra.mxu1 %vm1509_vm11, %v1495_v56 }
 0x227   : > { %v1001_v3 = vpop.permute.xlu1 %1000 }
 0x228   : > { %v907_v32 = vpop.permute.xlu0 %906  ;;  %v1430_v54 = vsel %vm1405_vm8, %v1397_v30, %v1001_v3 }
 0x229   : > { %v1398_v10 = vsel %vm1372_vm7, %v1365_v4, %v907_v32 }
 0x22a   : > { %v3690_v19 = vpop.f32.mrf.mxu0 }
 0x22b   : > { %1986 = vst [vmem:[%s3458_s14 + $0x48] sm:$0xff] %v3690_v19  ;;  %v717_v55 = vpop.permute.xlu1 %716 }
 0x22c   : > { %v3694_v38 = vpop.f32.mrf.mxu0  ;;  %v623_v2 = vpop.permute.xlu0 %622  ;;  %v1333_v58 = vsel %vm1306_vm5, %v1300_v5, %v717_v55 }
 0x22d   : > { %1985 = vst [vmem:[%s3458_s14 + $0x40] sm:$0xff] %v3694_v38  ;;  %v1301_v55 = vsel %vm1273_vm4, %v1268_v44, %v623_v2  ;;  %v4099_v44 = vld [vmem:[#allocation36_spill] sm:$0xff] }
 0x22f   : > { %v1097_v25 = vpop.permute.xlu1 %1096 }
 0x230   : > { %v1003_v50 = vpop.permute.xlu0 %1002  ;;  %v1463_v13 = vsel %vm1438_vm9, %v1430_v54, %v1097_v25 }
 0x231   : > { %v1431_v20 = vsel %vm1405_vm8, %v1398_v10, %v1003_v50 }
 0x233   : > { %v813_v42 = vpop.permute.xlu1 %812 }
 0x234   : > { %v719_v9 = vpop.permute.xlu0 %718  ;;  %v1366_v37 = vsel %vm1339_vm6, %v1333_v58, %v813_v42 }
 0x235   : > { %v1334_v27 = vsel %vm1306_vm5, %v1301_v55, %v719_v9  ;;  %v1272_v55 = vsel %vm1240_vm3, %v3510_v17, %v4099_v44 }
 0x237   : > { %v1193_v62 = vpop.permute.xlu1 %1192 }
 0x238   : > { %v1496_v41 = vsel %vm1471_vm10, %v1463_v13, %v1193_v62  ;;  %v1099_v57 = vpop.permute.xlu0 %1098 }
 0x239   : > { %2223 = vmatprep.mubr.msk.f32.mxu1 %vm1509_vm11, %v1496_v41  ;;  %v1464_v14 = vsel %vm1438_vm9, %v1431_v20, %v1099_v57 }
 0x23b   : > { %v909_v61 = vpop.permute.xlu1 %908 }
 0x23c   : > { %v815_v26 = vpop.permute.xlu0 %814  ;;  %v1399_v3 = vsel %vm1372_vm7, %v1366_v37, %v909_v61 }
 0x23d   : > { %v1367_v6 = vsel %vm1339_vm6, %v1334_v27, %v815_v26  ;;  %v4097_v26 = vld [vmem:[#allocation35_spill] sm:$0xff] }
 0x23e   : > { %v1269_v4 = vsel %vm1240_vm3, %v3408_v12, %v4097_v26  ;;  %v4098_v12 = vld [vmem:[#allocation34_spill] sm:$0xff] }
 0x23f   : > { %v625_v34 = vpop.permute.xlu1 %624 }
 0x240   : > { %v1195_v52 = vpop.permute.xlu0 %1194  ;;  %v1302_v10 = vsel %vm1273_vm4, %v1269_v4, %v625_v34  ;;  %v1270_v34 = vsel %vm1240_vm3, %v3424_v47, %v4098_v12 }
 0x241   : > { %v1497_v28 = vsel %vm1471_vm10, %v1464_v14, %v1195_v52 }
 0x242   : > { %v3720_v59 = vpop.f32.mrf.mxu0  ;;  %2224 = vmatmul.mubr.msk.f32.gmra.mxu1 %vm1509_vm11, %v1497_v28 }
 0x243   : > { %1988 = vst [vmem:[%s3458_s14 + $0x58] sm:$0xff] %v3720_v59  ;;  %v1005_v24 = vpop.permute.xlu1 %1004 }
 0x244   : > { %v3725_v45 = vpop.f32.mrf.mxu0  ;;  %v911_v22 = vpop.permute.xlu0 %910  ;;  %v1432_v32 = vsel %vm1405_vm8, %v1399_v3, %v1005_v24 }
 0x245   : > { %1987 = vst [vmem:[%s3458_s14 + $0x50] sm:$0xff] %v3725_v45  ;;  %v1400_v30 = vsel %vm1372_vm7, %v1367_v6, %v911_v22 }
 0x247   : > { %v721_v7 = vpop.permute.xlu1 %720 }
 0x248   : > { %v627_v63 = vpop.permute.xlu0 %626  ;;  %v1335_v20 = vsel %vm1306_vm5, %v1302_v10, %v721_v7 }
 0x249   : > { %v1303_v7 = vsel %vm1273_vm4, %v1270_v34, %v627_v63 }
 0x24b   : > { %v1101_v0 = vpop.permute.xlu1 %1100 }
 0x24c   : > { %v1007_v35 = vpop.permute.xlu0 %1006  ;;  %v1465_v25 = vsel %vm1438_vm9, %v1432_v32, %v1101_v0 }
 0x24d   : > { %v1433_v13 = vsel %vm1405_vm8, %v1400_v30, %v1007_v35 }
 0x24f   : > { %v817_v8 = vpop.permute.xlu1 %816 }
 0x250   : > { %v723_v56 = vpop.permute.xlu0 %722  ;;  %v1368_v52 = vsel %vm1339_vm6, %v1335_v20, %v817_v8 }
 0x251   : > { %v1336_v58 = vsel %vm1306_vm5, %v1303_v7, %v723_v56 }
 0x253   : > { %v1197_v50 = vpop.permute.xlu1 %1196 }
 0x254   : > { %v1498_v11 = vsel %vm1471_vm10, %v1465_v25, %v1197_v50  ;;  %v1103_v39 = vpop.permute.xlu0 %1102 }
 0x255   : > { %2226 = vmatprep.mubr.msk.f32.mxu1 %vm1509_vm11, %v1498_v11  ;;  %v1466_v41 = vsel %vm1438_vm9, %v1433_v13, %v1103_v39 }
 0x257   : > { %v913_v46 = vpop.permute.xlu1 %912 }
 0x258   : > { %v819_v42 = vpop.permute.xlu0 %818  ;;  %v1401_v24 = vsel %vm1372_vm7, %v1368_v52, %v913_v46  ;;  %v4100_v46 = vld [vmem:[#allocation37_spill] sm:$0xff] }
 0x259   : > { %v1369_v37 = vsel %vm1339_vm6, %v1336_v58, %v819_v42  ;;  %v1271_v27 = vsel %vm1240_vm3, %v3494_v49, %v4100_v46 }
 0x25a   : > { %v3747_v54 = vpop.f32.mrf.mxu0 }
 0x25b   : > { %1990 = vst [vmem:[%s3458_s14 + $0x68] sm:$0xff] %v3747_v54  ;;  %v629_v62 = vpop.permute.xlu1 %628 }
 0x25c   : > { %v3753_v15 = vpop.f32.mrf.mxu0  ;;  %v1199_v2 = vpop.permute.xlu0 %1198  ;;  %v1304_v6 = vsel %vm1273_vm4, %v1271_v27, %v629_v62 }
 0x25d   : > { %1989 = vst [vmem:[%s3458_s14 + $0x60] sm:$0xff] %v3753_v15  ;;  %v1499_v9 = vsel %vm1471_vm10, %v1466_v41, %v1199_v2 }
 0x25e   : > { %2227 = vmatmul.mubr.msk.f32.gmra.mxu1 %vm1509_vm11, %v1499_v9 }
 0x25f   : > { %v1009_v57 = vpop.permute.xlu1 %1008 }
 0x260   : > { %v915_v21 = vpop.permute.xlu0 %914  ;;  %v1434_v22 = vsel %vm1405_vm8, %v1401_v24, %v1009_v57 }
 0x261   : > { %v1402_v3 = vsel %vm1372_vm7, %v1369_v37, %v915_v21 }
 0x263   : > { %v725_v33 = vpop.permute.xlu1 %724 }
 0x264   : > { %v631_v1 = vpop.permute.xlu0 %630  ;;  %v1337_v41 = vsel %vm1306_vm5, %v1304_v6, %v725_v33 }
 0x265   : > { %v1305_v42 = vsel %vm1273_vm4, %v1272_v55, %v631_v1 }
 0x267   : > { %v1105_v61 = vpop.permute.xlu1 %1104 }
 0x268   : > { %v1011_v51 = vpop.permute.xlu0 %1010  ;;  %v1467_v0 = vsel %vm1438_vm9, %v1434_v22, %v1105_v61 }
 0x269   : > { %v1435_v25 = vsel %vm1405_vm8, %v1402_v3, %v1011_v51 }
 0x26b   : > { %v821_v14 = vpop.permute.xlu1 %820 }
 0x26c   : > { %v727_v28 = vpop.permute.xlu0 %726  ;;  %v1370_v57 = vsel %vm1339_vm6, %v1337_v41, %v821_v14 }
 0x26d   : > { %v1338_v30 = vsel %vm1306_vm5, %v1305_v42, %v727_v28 }
 0x26f   : > { %v1201_v35 = vpop.permute.xlu1 %1200 }
 0x270   : > { %v1500_v31 = vsel %vm1471_vm10, %v1467_v0, %v1201_v35  ;;  %v1107_v60 = vpop.permute.xlu0 %1106  ;;  %v1835_v35 = vadd.f32 %v3466_v23, %v3477_v48 }
 0x271   : > { %2229 = vmatprep.mubr.msk.f32.mxu1 %vm1509_vm11, %v1500_v31  ;;  %v1468_v11 = vsel %vm1438_vm9, %v1435_v25, %v1107_v60 }
 0x272   : > { %v1836_v31 = vadd.f32 %v1835_v35, %v3546_v29 }
 0x273   : > { %v917_v5 = vpop.permute.xlu1 %916 }
 0x274   : > { %v823_v8 = vpop.permute.xlu0 %822  ;;  %v1403_v49 = vsel %vm1372_vm7, %v1370_v57, %v917_v5  ;;  %v1837_v60 = vadd.f32 %v3537_v36, %v1836_v31 }
 0x275   : > { %v1371_v2 = vsel %vm1339_vm6, %v1338_v30, %v823_v8 }
 0x276   : > { %v3777_v32 = vpop.f32.mrf.mxu0  ;;  %v1838_v12 = vadd.f32 %v1837_v60, %v3608_v16 }
 0x277   : > { %1992 = vst [vmem:[%s3458_s14 + $0x78] sm:$0xff] %v3777_v32  ;;  %v919_v50 = vpop.permute.xlu1 %918 }
 0x278   : > { %v3783_v47 = vpop.f32.mrf.mxu0  ;;  %v1203_v63 = vpop.permute.xlu0 %1202  ;;  %v1404_v17 = vsel %vm1372_vm7, %v1371_v2, %v919_v50  ;;  %v1839_v34 = vadd.f32 %v3595_v53, %v1838_v12 }
 0x279   : > { %1991 = vst [vmem:[%s3458_s14 + $0x70] sm:$0xff] %v3783_v47  ;;  %v1501_v56 = vsel %vm1471_vm10, %v1468_v11, %v1203_v63 }
 0x27a   : > { %2230 = vmatmul.mubr.msk.f32.gmra.mxu1 %vm1509_vm11, %v1501_v56  ;;  %v1840_v7 = vadd.f32 %v1839_v34, %v3659_v43 }
 0x27b   : > { %v1015_v39 = vpop.permute.xlu1 %1014 }
 0x27c   : > { %v1013_v40 = vpop.permute.xlu0 %1012  ;;  %v1437_v21 = vsel %vm1405_vm8, %v1404_v17, %v1015_v39  ;;  %v1841_v8 = vadd.f32 %v3654_v18, %v1840_v7 }
 0x27d   : > { %v1436_v62 = vsel %vm1405_vm8, %v1403_v49, %v1013_v40 }
 0x27e   : > { %v1842_v37 = vadd.f32 %v1841_v8, %v3694_v38 }
 0x27f   : > { %v1111_v13 = vpop.permute.xlu1 %1110 }
 0x280   : > { %v1109_v9 = vpop.permute.xlu0 %1108  ;;  %v1470_v1 = vsel %vm1438_vm9, %v1437_v21, %v1111_v13  ;;  %v1843_v3 = vadd.f32 %v3690_v19, %v1842_v37 }
 0x281   : > { %v1469_v61 = vsel %vm1438_vm9, %v1436_v62, %v1109_v9 }
 0x282   : > { %v1844_v25 = vadd.f32 %v1843_v3, %v3725_v45 }
 0x283   : > { %v1207_v33 = vpop.permute.xlu1 %1206 }
 0x284   : > { %v1503_v51 = vsel %vm1471_vm10, %v1470_v1, %v1207_v33  ;;  %v1205_v26 = vpop.permute.xlu0 %1204  ;;  %v1845_v50 = vadd.f32 %v3720_v59, %v1844_v25 }
 0x285   : > { %v1502_v4 = vsel %vm1471_vm10, %v1469_v61, %v1205_v26 }
 0x286   : > { %2232 = vmatprep.mubr.msk.f32.mxu1 %vm1509_vm11, %v1502_v4  ;;  %v1846_v11 = vadd.f32 %v1845_v50, %v3753_v15 }
 0x287   : > { %2233 = vmatmul.mubr.msk.f32.gmra.mxu1 %vm1509_vm11, %v1503_v51 }
 0x288   : > { %v1847_v63 = vadd.f32 %v3747_v54, %v1846_v11 }
 0x28a   : > { %v1848_v56 = vadd.f32 %v1847_v63, %v3783_v47 }
 0x28c   : > { %v1849_v39 = vadd.f32 %v3777_v32, %v1848_v56 }
 0x292   : > { %v3811_v10 = vpop.f32.mrf.mxu1 }
 0x293   : > { %1994 = vst [vmem:[%s3458_s14 + $0x88] sm:$0xff] %v3811_v10 }
 0x294   : > { %v3815_v20 = vpop.f32.mrf.mxu1 }
 0x295   : > { %1993 = vst [vmem:[%s3458_s14 + $0x80] sm:$0xff] %v3815_v20  ;;  %v1850_v44 = vadd.f32 %v1849_v39, %v3815_v20 }
 0x297   : > { %v1851_v46 = vadd.f32 %v3811_v10, %v1850_v44 }
 0x2ae   : > { %v3819_v14 = vpop.f32.mrf.mxu1 }
 0x2af   : > { %1996 = vst [vmem:[%s3458_s14 + $0x98] sm:$0xff] %v3819_v14 }
 0x2b0   : > { %v3823_v52 = vpop.f32.mrf.mxu1 }
 0x2b1   : > { %1995 = vst [vmem:[%s3458_s14 + $0x90] sm:$0xff] %v3823_v52  ;;  %v1852_v27 = vadd.f32 %v1851_v46, %v3823_v52 }
 0x2b3   : > { %v1853_v42 = vadd.f32 %v3819_v14, %v1852_v27 }
 0x2ca   : > { %v3827_v28 = vpop.f32.mrf.mxu1 }
 0x2cb   : > { %1998 = vst [vmem:[%s3458_s14 + $0xa8] sm:$0xff] %v3827_v28 }
 0x2cc   : > { %v3831_v24 = vpop.f32.mrf.mxu1 }
 0x2cd   : > { %1997 = vst [vmem:[%s3458_s14 + $0xa0] sm:$0xff] %v3831_v24  ;;  %v1854_v6 = vadd.f32 %v1853_v42, %v3831_v24 }
 0x2cf   : > { %v1855_v30 = vadd.f32 %v3827_v28, %v1854_v6 }
 0x2e6   : > { %v3835_v22 = vpop.f32.mrf.mxu1 }
 0x2e7   : > { %2000 = vst [vmem:[%s3458_s14 + $0xb8] sm:$0xff] %v3835_v22 }
 0x2e8   : > { %v3839_v0 = vpop.f32.mrf.mxu1 }
 0x2e9   : > { %1999 = vst [vmem:[%s3458_s14 + $0xb0] sm:$0xff] %v3839_v0  ;;  %v1856_v13 = vadd.f32 %v1855_v30, %v3839_v0 }
 0x2eb   : > { %v1857_v41 = vadd.f32 %v3835_v22, %v1856_v13 }
 0x302   : > { %v3850_v5 = vpop.f32.mrf.mxu1 }
 0x303   : > { %2002 = vst [vmem:[%s3458_s14 + $0xc8] sm:$0xff] %v3850_v5 }
 0x304   : > { %v3854_v58 = vpop.f32.mrf.mxu1 }
 0x305   : > { %2001 = vst [vmem:[%s3458_s14 + $0xc0] sm:$0xff] %v3854_v58  ;;  %v1858_v2 = vadd.f32 %v1857_v41, %v3854_v58 }
 0x307   : > { %v1859_v57 = vadd.f32 %v3850_v5, %v1858_v2 }
 0x31e   : > { %v3867_v40 = vpop.f32.mrf.mxu1 }
 0x31f   : > { %2004 = vst [vmem:[%s3458_s14 + $0xd8] sm:$0xff] %v3867_v40 }
 0x320   : > { %v3872_v55 = vpop.f32.mrf.mxu1 }
 0x321   : > { %2003 = vst [vmem:[%s3458_s14 + $0xd0] sm:$0xff] %v3872_v55  ;;  %v1860_v49 = vadd.f32 %v1859_v57, %v3872_v55 }
 0x323   : > { %v1861_v21 = vadd.f32 %v3867_v40, %v1860_v49 }
 0x33a   : > { %v3884_v9 = vpop.f32.mrf.mxu1 }
 0x33b   : > { %2006 = vst [vmem:[%s3458_s14 + $0xe8] sm:$0xff] %v3884_v9 }
 0x33c   : > { %v3889_v17 = vpop.f32.mrf.mxu1 }
 0x33d   : > { %2005 = vst [vmem:[%s3458_s14 + $0xe0] sm:$0xff] %v3889_v17  ;;  %v1862_v62 = vadd.f32 %v1861_v21, %v3889_v17 }
 0x33f   : > { %v1863_v33 = vadd.f32 %v3884_v9, %v1862_v62 }
 0x347   : > { %v3896_v1 = vpop.f32.mrf.mxu1 }
 0x348   : > { %2008 = vst [vmem:[%s3458_s14 + $0xf8] sm:$0xff] %v3896_v1 }
 0x349   : > { %v3901_v61 = vpop.f32.mrf.mxu1 }
 0x34a   : > { %v1864_v51 = vadd.f32 %v1863_v33, %v3901_v61  ;;  %2007 = vst [vmem:[%s3458_s14 + $0xf0] sm:$0xff] %v3901_v61 }
 0x34c   : > { %v1865_v26 = vadd.f32 %v3896_v1, %v1864_v51 }
 0x34e   : > { %v1866_v4 = vrot.slane %v1865_v26, 4 }
 0x350   : > { %v1867_v35 = vadd.f32 %v1866_v4, %v1865_v26 }
 0x352   : > { %v1868_v31 = vrot.slane %v1867_v35, 2 }
 0x354   : > { %v1869_v60 = vadd.f32 %v1868_v31, %v1867_v35 }
 0x356   : > { %v1870_v12 = vrot.slane %v1869_v60, 1 }
 0x358   : > { %v3907_v34 = vadd.f32 %v1870_v12, %v1869_v60 }
 0x35a   : > { %v3910_v7 = vmul.f32 0.00390625, %v3907_v34 }
 0x35c   : > { %v1873_v8 = vsub.f32 %v3477_v48, %v3910_v7  ;;  %v1874_v37 = vsub.f32 %v3466_v23, %v3910_v7  ;;  %v1875_v3 = vsub.f32 %v3546_v29, %v3910_v7  ;;  %v1876_v11 = vsub.f32 %v3537_v36, %v3910_v7 }
 0x35d   : > { %v1877_v63 = vsub.f32 %v3608_v16, %v3910_v7  ;;  %v1878_v44 = vsub.f32 %v3595_v53, %v3910_v7  ;;  %v1879_v23 = vsub.f32 %v3659_v43, %v3910_v7  ;;  %v1880_v42 = vsub.f32 %v3654_v18, %v3910_v7 }
 0x35e   : > { %v1905_v25 = vmul.f32 %v1873_v8, %v1873_v8  ;;  %v1906_v50 = vmul.f32 %v1874_v37, %v1874_v37  ;;  %v1907_v56 = vmul.f32 %v1875_v3, %v1875_v3  ;;  %v1908_v48 = vmul.f32 %v1876_v11, %v1876_v11 }
 0x35f   : > { %v1909_v27 = vmul.f32 %v1877_v63, %v1877_v63  ;;  %v1910_v6 = vmul.f32 %v1878_v44, %v1878_v44  ;;  %v1881_v16 = vsub.f32 %v3694_v38, %v3910_v7  ;;  %v1911_v30 = vmul.f32 %v1879_v23, %v1879_v23 }
 0x360   : > { %v1937_v39 = vadd.f32 %v1906_v50, %v1905_v25  ;;  %v1882_v53 = vsub.f32 %v3690_v19, %v3910_v7  ;;  %v1912_v41 = vmul.f32 %v1880_v42, %v1880_v42  ;;  %v1883_v43 = vsub.f32 %v3725_v45, %v3910_v7 }
 0x361   : > { %v1913_v57 = vmul.f32 %v1881_v16, %v1881_v16  ;;  %v1884_v18 = vsub.f32 %v3720_v59, %v3910_v7  ;;  %v1885_v38 = vsub.f32 %v3753_v15, %v3910_v7  ;;  %v1886_v19 = vsub.f32 %v3747_v54, %v3910_v7 }
 0x362   : > { %v1938_v46 = vadd.f32 %v1937_v39, %v1907_v56  ;;  %v1914_v21 = vmul.f32 %v1882_v53, %v1882_v53  ;;  %v1915_v33 = vmul.f32 %v1883_v43, %v1883_v43  ;;  %v1887_v45 = vsub.f32 %v3783_v47, %v3910_v7 }
 0x363   : > { %v1916_v26 = vmul.f32 %v1884_v18, %v1884_v18  ;;  %v1917_v35 = vmul.f32 %v1885_v38, %v1885_v38  ;;  %v1888_v59 = vsub.f32 %v3777_v32, %v3910_v7  ;;  %v1918_v60 = vmul.f32 %v1886_v19, %v1886_v19 }
 0x364   : > { %v1939_v29 = vadd.f32 %v1938_v46, %v1908_v48  ;;  %v1889_v15 = vsub.f32 %v3815_v20, %v3910_v7  ;;  %v1919_v8 = vmul.f32 %v1887_v45, %v1887_v45  ;;  %v1890_v54 = vsub.f32 %v3811_v10, %v3910_v7 }
 0x365   : > { %v1920_v3 = vmul.f32 %v1888_v59, %v1888_v59  ;;  %v1891_v47 = vsub.f32 %v3823_v52, %v3910_v7  ;;  %v1892_v32 = vsub.f32 %v3819_v14, %v3910_v7  ;;  %v1893_v20 = vsub.f32 %v3831_v24, %v3910_v7 }
 0x366   : > { %v1940_v36 = vadd.f32 %v1939_v29, %v1909_v27  ;;  %v1921_v50 = vmul.f32 %v1889_v15, %v1889_v15  ;;  %v1922_v63 = vmul.f32 %v1890_v54, %v1890_v54  ;;  %v1894_v10 = vsub.f32 %v3827_v28, %v3910_v7 }
 0x367   : > { %v1923_v39 = vmul.f32 %v1891_v47, %v1891_v47  ;;  %v1924_v48 = vmul.f32 %v1892_v32, %v1892_v32  ;;  %v1895_v52 = vsub.f32 %v3839_v0, %v3910_v7  ;;  %v1925_v23 = vmul.f32 %v1893_v20, %v1893_v20 }
 0x368   : > { %v1941_v13 = vadd.f32 %v1940_v36, %v1910_v6  ;;  %v1896_v14 = vsub.f32 %v3835_v22, %v3910_v7  ;;  %v1926_v29 = vmul.f32 %v1894_v10, %v1894_v10  ;;  %v1897_v24 = vsub.f32 %v3854_v58, %v3910_v7 }
 0x369   : > { %v1927_v6 = vmul.f32 %v1895_v52, %v1895_v52  ;;  %v1898_v28 = vsub.f32 %v3850_v5, %v3910_v7  ;;  %v1899_v0 = vsub.f32 %v3872_v55, %v3910_v7  ;;  %v1900_v22 = vsub.f32 %v3867_v40, %v3910_v7 }
 0x36a   : > { %v1942_v2 = vadd.f32 %v1941_v13, %v1911_v30  ;;  %v1928_v16 = vmul.f32 %v1896_v14, %v1896_v14  ;;  %v1929_v13 = vmul.f32 %v1897_v24, %v1897_v24  ;;  %v1901_v58 = vsub.f32 %v3889_v17, %v3910_v7 }
 0x36b   : > { %v1931_v43 = vmul.f32 %v1899_v0, %v1899_v0  ;;  %v1902_v5 = vsub.f32 %v3884_v9, %v3910_v7  ;;  %v1903_v55 = vsub.f32 %v3901_v61, %v3910_v7  ;;  %v1904_v40 = vsub.f32 %v3896_v1, %v3910_v7 }
 0x36c   : > { %v1943_v49 = vadd.f32 %v1942_v2, %v1912_v41  ;;  %v1930_v41 = vmul.f32 %v1898_v28, %v1898_v28 }
 0x36d   : > { %v1934_v38 = vmul.f32 %v1902_v5, %v1902_v5  ;;  %v1936_v19 = vmul.f32 %v1904_v40, %v1904_v40 }
 0x36e   : > { %v1944_v62 = vadd.f32 %v1943_v49, %v1913_v57  ;;  %v1932_v49 = vmul.f32 %v1900_v22, %v1900_v22 }
 0x370   : > { %v1945_v51 = vadd.f32 %v1944_v62, %v1914_v21  ;;  %v1933_v21 = vmul.f32 %v1901_v58, %v1901_v58 }
 0x372   : > { %v1946_v4 = vadd.f32 %v1945_v51, %v1915_v33  ;;  %v1935_v51 = vmul.f32 %v1903_v55, %v1903_v55 }
 0x374   : > { %v1947_v31 = vadd.f32 %v1946_v4, %v1916_v26 }
 0x376   : > { %v1948_v12 = vadd.f32 %v1947_v31, %v1917_v35 }
 0x378   : > { %v1949_v37 = vadd.f32 %v1948_v12, %v1918_v60 }
 0x37a   : > { %v1950_v25 = vadd.f32 %v1949_v37, %v1919_v8 }
 0x37c   : > { %v1951_v11 = vadd.f32 %v1950_v25, %v1920_v3 }
 0x37e   : > { %v1952_v56 = vadd.f32 %v1951_v11, %v1921_v50 }
 0x380   : > { %v1953_v44 = vadd.f32 %v1952_v56, %v1922_v63 }
 0x382   : > { %v1954_v46 = vadd.f32 %v1953_v44, %v1923_v39 }
 0x384   : > { %v1955_v27 = vadd.f32 %v1954_v46, %v1924_v48 }
 0x386   : > { %v1956_v42 = vadd.f32 %v1955_v27, %v1925_v23 }
 0x388   : > { %v1957_v36 = vadd.f32 %v1956_v42, %v1926_v29 }
 0x38a   : > { %v1958_v30 = vadd.f32 %v1957_v36, %v1927_v6 }
 0x38c   : > { %v1959_v53 = vadd.f32 %v1958_v30, %v1928_v16 }
 0x38e   : > { %v1960_v2 = vadd.f32 %v1959_v53, %v1929_v13 }
 0x390   : > { %v1961_v57 = vadd.f32 %v1960_v2, %v1930_v41 }
 0x392   : > { %v1962_v18 = vadd.f32 %v1961_v57, %v1931_v43 }
 0x394   : > { %v1963_v62 = vadd.f32 %v1962_v18, %v1932_v49 }
 0x396   : > { %v1964_v33 = vadd.f32 %v1963_v62, %v1933_v21 }
 0x398   : > { %v1965_v17 = vadd.f32 %v1964_v33, %v1934_v38 }
 0x39a   : > { %v1966_v26 = vadd.f32 %v1965_v17, %v1935_v51 }
 0x39c   : > { %v1967_v4 = vadd.f32 %v1966_v26, %v1936_v19 }
 0x39e   : > { %v1968_v45 = vrot.slane %v1967_v4, 4 }
 0x3a0   : > { %v1969_v9 = vadd.f32 %v1968_v45, %v1967_v4 }
 0x3a2   : > { %v1970_v35 = vrot.slane %v1969_v9, 2 }
 0x3a4   : > { %v1971_v31 = vadd.f32 %v1970_v35, %v1969_v9 }
 0x3a6   : > { %v1972_v59 = vrot.slane %v1971_v31, 1 }
 0x3a8   : > { %v1973_v61 = vadd.f32 %v1972_v59, %v1971_v31 }
 0x3aa   : > { %v1975_v1 = vsel %vm1974_vm12, %v3907_v34, %v1973_v61 }
 0x3ab   : > { %1976 = vst [vmem:[%s181_s18] sm:$0x3] %v1975_v1 }
 0x3ac PF: > { %s14_s12 = sadd.s32 1, %s2298_s12  }
 0x3ad   : > { %p11_p4 = scmp.ge.s32.totalorder %s14_s12, 4  }
 0x3af   :  { %13 = sbr.rel (!%p11_p4) target bundleno = 1 (0x1), region = 70 }

</bundles_post_ra>
